<compile_context>
chip_gen: v6e
topology: v6e:2x2x1
jax: 0.10.0
libtpu: 0.0.40
codegen_flags: <defaults>
</compile_context>

<pallas_src>
import jax
import jax.numpy as jnp
from jax.experimental import pallas as pl
from jax.experimental.pallas import tpu as pltpu

# ----------------------------- sizes (small demo) ---------------------------
N_NODES = 8          # number of graph nodes
NUM_FEATURES = 16    # dataset.num_features
HIDDEN = 32          # node_hidden_dim == edge_hidden_dim == args.node_emb
NUM_EDGE_TYPE = 4
N_EDGES = 16


def _full_spec(shape):
    # single-block spec: block == full array (satisfies the (8,128) rule)
    return pl.BlockSpec(shape, lambda i: (0,) * len(shape))


# --------------------------- the fused encoder kernel ------------------------
def _encoder_fused_kernel(
        x_ref, src_ref, tgt_ref, user_ref, ea_ref,
        lin0_w_ref, lin0_b_ref,
        wr_ref, wp_ref, bu_ref,
        wee_ref, wex_ref, bi_ref,
        rep_ref, sum_ref,
        conv_b_ref,
        gru_wi_ref, gru_wh_ref,
        b_r_ref, b_z_ref, b_in_ref, b_hn_ref,
        o_ref):
    f32 = jnp.float32
    n = x_ref.shape[0]
    e = src_ref.shape[0]
    hd = lin0_w_ref.shape[1]

    # 1) out = relu(lin0(x)); h = out
    out0 = jnp.maximum(
        jnp.dot(x_ref[...], lin0_w_ref[...], preferred_element_type=f32)
        + lin0_b_ref[...], 0.0)                                        # (N, H)
    h = out0

    # 2) gather source-node features + user flags via one-hot matmul (MXU)
    gather = (jax.lax.broadcasted_iota(jnp.int32, (e, n), 1)
              == src_ref[...]).astype(f32)                             # (E, N)
    xj = jnp.dot(gather, out0, preferred_element_type=f32)             # (E, H)
    umask = jnp.sum(gather * user_ref[...], axis=1, keepdims=True)     # (E, 1) in {0,1}

    # 3) per-edge flattened HxH weight generation (all MXU matmuls)
    ea = ea_ref[...]                                                   # (E, T)
    w_user = (jnp.dot(xj, wr_ref[...], preferred_element_type=f32)     # rating_network(x_src)
              + jnp.dot(ea, wp_ref[...], preferred_element_type=f32)   # personalized_network(edge_attr)
              + bu_ref[...])
    w_item = (jnp.dot(ea, wee_ref[...], preferred_element_type=f32)    # edge_network(concat(ea, x_src))
              + jnp.dot(xj, wex_ref[...], preferred_element_type=f32)
              + bi_ref[...])
    w = umask * w_user + (1.0 - umask) * w_item                        # (E, H*H)

    # 4) per-edge matvec msg[e,k] = sum_h xj[e,h] * w[e, h*H + k]
    #    done as expand (REP) -> elementwise -> contract (SUM) matmuls
    xj_rep = jnp.dot(xj, rep_ref[...], preferred_element_type=f32)     # (E, H*H): [e,h*H+k]=xj[e,h]
    msg = jnp.dot(xj_rep * w, sum_ref[...], preferred_element_type=f32)  # (E, H)

    # 5) scatter-mean over target nodes via one-hot matmul
    scatter = (jax.lax.broadcasted_iota(jnp.int32, (n, e), 0)
               == tgt_ref[...]).astype(f32)                            # (N, E)
    aggr = jnp.dot(scatter, msg, preferred_element_type=f32)           # (N, H)
    cnt = jnp.sum(scatter, axis=1, keepdims=True)                      # (N, 1)
    aggr = aggr / jnp.maximum(cnt, 1.0)

    # 6) m = relu(conv + bias); GRU cell (PyTorch gate order r, z, n); relu
    m = jnp.maximum(aggr + conv_b_ref[...], 0.0)
    w_ir = gru_wi_ref[0:hd, :]
    w_iz = gru_wi_ref[hd:2 * hd, :]
    w_in = gru_wi_ref[2 * hd:3 * hd, :]
    w_hr = gru_wh_ref[0:hd, :]
    w_hz = gru_wh_ref[hd:2 * hd, :]
    w_hn = gru_wh_ref[2 * hd:3 * hd, :]

    r = jax.nn.sigmoid(jnp.dot(m, w_ir, preferred_element_type=f32)
                       + jnp.dot(h, w_hr, preferred_element_type=f32)
                       + b_r_ref[...])
    z = jax.nn.sigmoid(jnp.dot(m, w_iz, preferred_element_type=f32)
                       + jnp.dot(h, w_hz, preferred_element_type=f32)
                       + b_z_ref[...])
    ngate = jnp.tanh(jnp.dot(m, w_in, preferred_element_type=f32) + b_in_ref[...]
                     + r * (jnp.dot(h, w_hn, preferred_element_type=f32)
                            + b_hn_ref[...]))
    h_new = (1.0 - z) * ngate + z * h
    o_ref[...] = jnp.maximum(h_new, 0.0)


# ------------------------------- wrapper --------------------------------------
def encoder_forward(kp, x, edge_index, edge_attr, is_user):
    n = x.shape[0]
    e = edge_index.shape[1]
    hd = kp['lin0_w'].shape[1]

    src = edge_index[0].astype(jnp.int32).reshape(e, 1)     # (E, 1)
    tgt = edge_index[1].astype(jnp.int32).reshape(1, e)     # (1, E)
    user = is_user.astype(jnp.float32).reshape(1, n)        # (1, N)

    args = (x, src, tgt, user, edge_attr,
            kp['lin0_w'], kp['lin0_b'],
            kp['wr'], kp['wp'], kp['bu'],
            kp['wee'], kp['wex'], kp['bi'],
            kp['rep'], kp['sum'],
            kp['conv_b'],
            kp['gru_wi'], kp['gru_wh'],
            kp['b_r'], kp['b_z'], kp['b_in'], kp['b_hn'])

    return pl.pallas_call(
        _encoder_fused_kernel,
        out_shape=jax.ShapeDtypeStruct((n, hd), jnp.float32),
        grid=(1,),
        in_specs=[_full_spec(a.shape) for a in args],
        out_specs=_full_spec((n, hd)),
        compiler_params=pltpu.CompilerParams(
            dimension_semantics=("parallel",)),
    )(*args)


# ------------------------- deterministic parameter init ----------------------
def _init_linear(key, fan_in, fan_out):
    k1, k2 = jax.random.split(key)
    bound = 1.0 / (fan_in ** 0.5)
    w = jax.random.uniform(k1, (fan_in, fan_out), jnp.float32, -bound, bound)
    b = jax.random.uniform(k2, (1, fan_out), jnp.float32, -bound, bound)
    return w, b


def init_params(key):
    ks = jax.random.split(key, 8)
    p = {}
    p['lin0_w'], p['lin0_b'] = _init_linear(ks[0], NUM_FEATURES, HIDDEN)
    p['wr'], p['br'] = _init_linear(ks[1], HIDDEN, HIDDEN * HIDDEN)             # rating_network
    p['wp'], p['bp'] = _init_linear(ks[2], NUM_EDGE_TYPE, HIDDEN * HIDDEN)      # personalized_network
    we, p['be'] = _init_linear(ks[3], NUM_EDGE_TYPE + HIDDEN, HIDDEN * HIDDEN)  # edge_network
    p['we_e'], p['we_x'] = we[:NUM_EDGE_TYPE], we[NUM_EDGE_TYPE:]               # split concat weight
    p['conv_b'] = (jax.random.uniform(ks[4], (1, HIDDEN), jnp.float32, -1, 1)
                   / (HIDDEN ** 0.5))                                           # IRGPRConv output bias
    p['gru_wih'], p['gru_bih'] = _init_linear(ks[5], HIDDEN, 3 * HIDDEN)        # GRU input weights (H, 3H)
    p['gru_whh'], p['gru_bhh'] = _init_linear(ks[6], HIDDEN, 3 * HIDDEN)        # GRU hidden weights (H, 3H)
    return p


def prepare_kernel_params(p):
    """One-time re-layout of params into the kernel-friendly form."""
    H = p['lin0_w'].shape[1]
    gi, gh = p['gru_wih'], p['gru_whh']          # (H, 3H) column blocks [r|z|n]
    bih, bhh = p['gru_bih'], p['gru_bhh']        # (1, 3H)
    idx = jnp.arange(H * H)
    kp = {
        'lin0_w': p['lin0_w'], 'lin0_b': p['lin0_b'],
        'wr': p['wr'], 'wp': p['wp'], 'bu': p['br'] + p['bp'],
        'wee': p['we_e'], 'wex': p['we_x'], 'bi': p['be'],
        'conv_b': p['conv_b'],
        # GRU weights pre-split into row-stacked (3H, H): [W_r; W_z; W_n]
        'gru_wi': jnp.concatenate([gi[:, 0:H], gi[:, H:2 * H], gi[:, 2 * H:3 * H]], axis=0),
        'gru_wh': jnp.concatenate([gh[:, 0:H], gh[:, H:2 * H], gh[:, 2 * H:3 * H]], axis=0),
        'b_r': bih[:, 0:H] + bhh[:, 0:H],
        'b_z': bih[:, H:2 * H] + bhh[:, H:2 * H],
        'b_in': bih[:, 2 * H:3 * H],
        'b_hn': bhh[:, 2 * H:3 * H],
        # constant 0/1 expand / contract matrices for the per-edge matvec
        'rep': (idx[None, :] // H == jnp.arange(H)[:, None]).astype(jnp.float32),   # (H,  H*H)
        'sum': (idx[:, None] % H == jnp.arange(H)[None, :]).astype(jnp.float32),    # (H*H, H)
    }
    return kp


# ---------------------------- pure-JAX reference ------------------------------
def _reference_forward(p, x, edge_index, edge_attr, is_user):
    H = p['lin0_w'].shape[1]
    out = jax.nn.relu(x @ p['lin0_w'] + p['lin0_b'])
    h = out
    src, tgt = edge_index[0], edge_index[1]
    xj = out[src]
    mask = is_user[src].astype(jnp.float32)[:, None]
    w_user = xj @ p['wr'] + p['br'] + edge_attr @ p['wp'] + p['bp']
    w_item = edge_attr @ p['we_e'] + xj @ p['we_x'] + p['be']
    w = jnp.where(mask > 0.5, w_user, w_item).reshape(-1, H, H)
    msg = jnp.einsum('eh,ehk->ek', xj, w)
    summed = jnp.zeros((x.shape[0], H), jnp.float32).at[tgt].add(msg)
    counts = jnp.zeros((x.shape[0], 1), jnp.float32).at[tgt].add(1.0)
    aggr = summed / jnp.maximum(counts, 1.0)
    m = jax.nn.relu(aggr + p['conv_b'])
    gi = m @ p['gru_wih'] + p['gru_bih']
    gh = h @ p['gru_whh'] + p['gru_bhh']
    r = jax.nn.sigmoid(gi[:, :H] + gh[:, :H])
    z = jax.nn.sigmoid(gi[:, H:2 * H] + gh[:, H:2 * H])
    ngate = jnp.tanh(gi[:, 2 * H:] + r * gh[:, 2 * H:])
    return jax.nn.relu((1.0 - z) * ngate + z * h)


# ------------------------------------ main -----------------------------------
if __name__ == "__main__":
    key = jax.random.PRNGKey(0)
    k_par, k_x, k_ei, k_ea, k_u = jax.random.split(key, 5)

    params = init_params(k_par)
    kparams = prepare_kernel_params(params)

    x = jax.random.normal(k_x, (N_NODES, NUM_FEATURES), jnp.float32)
    edge_index = jax.random.randint(k_ei, (2, N_EDGES), 0, N_NODES, jnp.int32)
    edge_type = jax.random.randint(k_ea, (N_EDGES,), 0, NUM_EDGE_TYPE, jnp.int32)
    edge_attr = jax.nn.one_hot(edge_type, NUM_EDGE_TYPE, dtype=jnp.float32)
    is_user = jax.random.bernoulli(k_u, 0.5, (N_NODES,))

    fwd = jax.jit(encoder_forward)
    out = jax.block_until_ready(fwd(kparams, x, edge_index, edge_attr, is_user))

    # correctness vs. plain-JAX reference of the same forward semantics
    ref = _reference_forward(params, x, edge_index, edge_attr, is_user)
    assert out.shape == (N_NODES, HIDDEN)
    assert bool(jnp.all(jnp.isfinite(out)))
    assert bool(jnp.all(out >= 0.0))                      # final relu
    assert bool(jnp.allclose(out, ref, rtol=1e-4, atol=1e-4))
    print("KERNEL_OK")
</pallas_src>

<mosaic_0001>
module attributes {stable_mosaic.version = 11 : i64} {
  func.func @_encoder_fused_kernel(%arg0: i32, %arg1: memref<8x16xf32, #tpu.memory_space<vmem>>, %arg2: memref<16x1xi32, #tpu.memory_space<vmem>>, %arg3: memref<1x16xi32, #tpu.memory_space<vmem>>, %arg4: memref<1x8xf32, #tpu.memory_space<vmem>>, %arg5: memref<16x4xf32, #tpu.memory_space<vmem>>, %arg6: memref<16x32xf32, #tpu.memory_space<vmem>>, %arg7: memref<1x32xf32, #tpu.memory_space<vmem>>, %arg8: memref<32x1024xf32, #tpu.memory_space<vmem>>, %arg9: memref<4x1024xf32, #tpu.memory_space<vmem>>, %arg10: memref<1x1024xf32, #tpu.memory_space<vmem>>, %arg11: memref<4x1024xf32, #tpu.memory_space<vmem>>, %arg12: memref<32x1024xf32, #tpu.memory_space<vmem>>, %arg13: memref<1x1024xf32, #tpu.memory_space<vmem>>, %arg14: memref<32x1024xf32, #tpu.memory_space<vmem>>, %arg15: memref<1024x32xf32, #tpu.memory_space<vmem>>, %arg16: memref<1x32xf32, #tpu.memory_space<vmem>>, %arg17: memref<96x32xf32, #tpu.memory_space<vmem>>, %arg18: memref<96x32xf32, #tpu.memory_space<vmem>>, %arg19: memref<1x32xf32, #tpu.memory_space<vmem>>, %arg20: memref<1x32xf32, #tpu.memory_space<vmem>>, %arg21: memref<1x32xf32, #tpu.memory_space<vmem>>, %arg22: memref<1x32xf32, #tpu.memory_space<vmem>>, %arg23: memref<8x32xf32, #tpu.memory_space<vmem>>) attributes {dimension_semantics = [#tpu.dimension_semantics<parallel>], iteration_bounds = array<i64: 1>, scalar_prefetch = 0 : i64, scratch_operands = 0 : i64, tpu.core_type = #tpu.core_type<tc>, window_params = [{pipeline_mode = #tpu.pipeline_mode<synchronous>, transform_indices = @transform_0, window_bounds = array<i64: 8, 16>}, {pipeline_mode = #tpu.pipeline_mode<synchronous>, transform_indices = @transform_1, window_bounds = array<i64: 16, 1>}, {pipeline_mode = #tpu.pipeline_mode<synchronous>, transform_indices = @transform_2, window_bounds = array<i64: 1, 16>}, {pipeline_mode = #tpu.pipeline_mode<synchronous>, transform_indices = @transform_3, window_bounds = array<i64: 1, 8>}, {pipeline_mode = #tpu.pipeline_mode<synchronous>, transform_indices = @transform_4, window_bounds = array<i64: 16, 4>}, {pipeline_mode = #tpu.pipeline_mode<synchronous>, transform_indices = @transform_5, window_bounds = array<i64: 16, 32>}, {pipeline_mode = #tpu.pipeline_mode<synchronous>, transform_indices = @transform_6, window_bounds = array<i64: 1, 32>}, {pipeline_mode = #tpu.pipeline_mode<synchronous>, transform_indices = @transform_7, window_bounds = array<i64: 32, 1024>}, {pipeline_mode = #tpu.pipeline_mode<synchronous>, transform_indices = @transform_8, window_bounds = array<i64: 4, 1024>}, {pipeline_mode = #tpu.pipeline_mode<synchronous>, transform_indices = @transform_9, window_bounds = array<i64: 1, 1024>}, {pipeline_mode = #tpu.pipeline_mode<synchronous>, transform_indices = @transform_10, window_bounds = array<i64: 4, 1024>}, {pipeline_mode = #tpu.pipeline_mode<synchronous>, transform_indices = @transform_11, window_bounds = array<i64: 32, 1024>}, {pipeline_mode = #tpu.pipeline_mode<synchronous>, transform_indices = @transform_12, window_bounds = array<i64: 1, 1024>}, {pipeline_mode = #tpu.pipeline_mode<synchronous>, transform_indices = @transform_13, window_bounds = array<i64: 32, 1024>}, {pipeline_mode = #tpu.pipeline_mode<synchronous>, transform_indices = @transform_14, window_bounds = array<i64: 1024, 32>}, {pipeline_mode = #tpu.pipeline_mode<synchronous>, transform_indices = @transform_15, window_bounds = array<i64: 1, 32>}, {pipeline_mode = #tpu.pipeline_mode<synchronous>, transform_indices = @transform_16, window_bounds = array<i64: 96, 32>}, {pipeline_mode = #tpu.pipeline_mode<synchronous>, transform_indices = @transform_17, window_bounds = array<i64: 96, 32>}, {pipeline_mode = #tpu.pipeline_mode<synchronous>, transform_indices = @transform_18, window_bounds = array<i64: 1, 32>}, {pipeline_mode = #tpu.pipeline_mode<synchronous>, transform_indices = @transform_19, window_bounds = array<i64: 1, 32>}, {pipeline_mode = #tpu.pipeline_mode<synchronous>, transform_indices = @transform_20, window_bounds = array<i64: 1, 32>}, {pipeline_mode = #tpu.pipeline_mode<synchronous>, transform_indices = @transform_21, window_bounds = array<i64: 1, 32>}, {pipeline_mode = #tpu.pipeline_mode<synchronous>, transform_indices = @transform_22, window_bounds = array<i64: 8, 32>}]} {
    %c0 = arith.constant 0 : index
    %c0_0 = arith.constant 0 : index
    %0 = vector.load %arg1[%c0, %c0_0] : memref<8x16xf32, #tpu.memory_space<vmem>>, vector<8x16xf32>
    %c0_1 = arith.constant 0 : index
    %c0_2 = arith.constant 0 : index
    %1 = vector.load %arg6[%c0_1, %c0_2] : memref<16x32xf32, #tpu.memory_space<vmem>>, vector<16x32xf32>
    %cst = arith.constant dense<0.000000e+00> : vector<8x32xf32>
    %2 = tpu.matmul %0, %1, %cst {dimension_numbers = #tpu.dot_dimension_numbers<[1], [0], [0], [1], [0, 0, 1, 1], [], []>} : vector<8x16xf32>, vector<16x32xf32>, vector<8x32xf32> -> vector<8x32xf32>
    %c0_3 = arith.constant 0 : index
    %c0_4 = arith.constant 0 : index
    %3 = vector.load %arg7[%c0_3, %c0_4] : memref<1x32xf32, #tpu.memory_space<vmem>>, vector<1x32xf32>
    %4 = vector.broadcast %3 : vector<1x32xf32> to vector<8x32xf32>
    %5 = arith.addf %2, %4 : vector<8x32xf32>
    %cst_5 = arith.constant 0.000000e+00 : f32
    %6 = vector.broadcast %cst_5 : f32 to vector<8x32xf32>
    %7 = arith.maximumf %5, %6 : vector<8x32xf32>
    %8 = tpu.iota {dimensions = array<i32: 1>} : vector<16x8xi32>
    %c0_6 = arith.constant 0 : index
    %c0_7 = arith.constant 0 : index
    %9 = vector.load %arg2[%c0_6, %c0_7] : memref<16x1xi32, #tpu.memory_space<vmem>>, vector<16x1xi32>
    %10 = vector.broadcast %9 : vector<16x1xi32> to vector<16x8xi32>
    %11 = arith.cmpi eq, %8, %10 : vector<16x8xi32>
    %12 = arith.extui %11 : vector<16x8xi1> to vector<16x8xi32>
    %13 = arith.sitofp %12 : vector<16x8xi32> to vector<16x8xf32>
    %cst_8 = arith.constant dense<0.000000e+00> : vector<16x32xf32>
    %14 = tpu.matmul %13, %7, %cst_8 {dimension_numbers = #tpu.dot_dimension_numbers<[1], [0], [0], [1], [0, 0, 1, 1], [], []>} : vector<16x8xf32>, vector<8x32xf32>, vector<16x32xf32> -> vector<16x32xf32>
    %c0_9 = arith.constant 0 : index
    %c0_10 = arith.constant 0 : index
    %15 = vector.load %arg4[%c0_9, %c0_10] : memref<1x8xf32, #tpu.memory_space<vmem>>, vector<1x8xf32>
    %16 = vector.broadcast %15 : vector<1x8xf32> to vector<16x8xf32>
    %17 = arith.mulf %13, %16 : vector<16x8xf32>
    %cst_11 = arith.constant dense<0.000000e+00> : vector<16xf32>
    %18 = vector.multi_reduction <add>, %17, %cst_11 [1] : vector<16x8xf32> to vector<16xf32>
    %19 = vector.shape_cast %18 : vector<16xf32> to vector<16x1xf32>
    %c0_12 = arith.constant 0 : index
    %c0_13 = arith.constant 0 : index
    %20 = vector.load %arg5[%c0_12, %c0_13] : memref<16x4xf32, #tpu.memory_space<vmem>>, vector<16x4xf32>
    %c0_14 = arith.constant 0 : index
    %c0_15 = arith.constant 0 : index
    %21 = vector.load %arg8[%c0_14, %c0_15] : memref<32x1024xf32, #tpu.memory_space<vmem>>, vector<32x1024xf32>
    %cst_16 = arith.constant dense<0.000000e+00> : vector<16x1024xf32>
    %22 = tpu.matmul %14, %21, %cst_16 {dimension_numbers = #tpu.dot_dimension_numbers<[1], [0], [0], [1], [0, 0, 1, 1], [], []>} : vector<16x32xf32>, vector<32x1024xf32>, vector<16x1024xf32> -> vector<16x1024xf32>
    %c0_17 = arith.constant 0 : index
    %c0_18 = arith.constant 0 : index
    %23 = vector.load %arg9[%c0_17, %c0_18] : memref<4x1024xf32, #tpu.memory_space<vmem>>, vector<4x1024xf32>
    %cst_19 = arith.constant dense<0.000000e+00> : vector<16x1024xf32>
    %24 = tpu.matmul %20, %23, %cst_19 {dimension_numbers = #tpu.dot_dimension_numbers<[1], [0], [0], [1], [0, 0, 1, 1], [], []>} : vector<16x4xf32>, vector<4x1024xf32>, vector<16x1024xf32> -> vector<16x1024xf32>
    %25 = arith.addf %22, %24 : vector<16x1024xf32>
    %c0_20 = arith.constant 0 : index
    %c0_21 = arith.constant 0 : index
    %26 = vector.load %arg10[%c0_20, %c0_21] : memref<1x1024xf32, #tpu.memory_space<vmem>>, vector<1x1024xf32>
    %27 = vector.broadcast %26 : vector<1x1024xf32> to vector<16x1024xf32>
    %28 = arith.addf %25, %27 : vector<16x1024xf32>
    %c0_22 = arith.constant 0 : index
    %c0_23 = arith.constant 0 : index
    %29 = vector.load %arg11[%c0_22, %c0_23] : memref<4x1024xf32, #tpu.memory_space<vmem>>, vector<4x1024xf32>
    %cst_24 = arith.constant dense<0.000000e+00> : vector<16x1024xf32>
    %30 = tpu.matmul %20, %29, %cst_24 {dimension_numbers = #tpu.dot_dimension_numbers<[1], [0], [0], [1], [0, 0, 1, 1], [], []>} : vector<16x4xf32>, vector<4x1024xf32>, vector<16x1024xf32> -> vector<16x1024xf32>
    %c0_25 = arith.constant 0 : index
    %c0_26 = arith.constant 0 : index
    %31 = vector.load %arg12[%c0_25, %c0_26] : memref<32x1024xf32, #tpu.memory_space<vmem>>, vector<32x1024xf32>
    %cst_27 = arith.constant dense<0.000000e+00> : vector<16x1024xf32>
    %32 = tpu.matmul %14, %31, %cst_27 {dimension_numbers = #tpu.dot_dimension_numbers<[1], [0], [0], [1], [0, 0, 1, 1], [], []>} : vector<16x32xf32>, vector<32x1024xf32>, vector<16x1024xf32> -> vector<16x1024xf32>
    %33 = arith.addf %30, %32 : vector<16x1024xf32>
    %c0_28 = arith.constant 0 : index
    %c0_29 = arith.constant 0 : index
    %34 = vector.load %arg13[%c0_28, %c0_29] : memref<1x1024xf32, #tpu.memory_space<vmem>>, vector<1x1024xf32>
    %35 = vector.broadcast %34 : vector<1x1024xf32> to vector<16x1024xf32>
    %36 = arith.addf %33, %35 : vector<16x1024xf32>
    %37 = vector.broadcast %19 : vector<16x1xf32> to vector<16x1024xf32>
    %38 = arith.mulf %37, %28 : vector<16x1024xf32>
    %cst_30 = arith.constant 1.000000e+00 : f32
    %39 = vector.broadcast %cst_30 : f32 to vector<16x1xf32>
    %40 = arith.subf %39, %19 : vector<16x1xf32>
    %41 = vector.broadcast %40 : vector<16x1xf32> to vector<16x1024xf32>
    %42 = arith.mulf %41, %36 : vector<16x1024xf32>
    %43 = arith.addf %38, %42 : vector<16x1024xf32>
    %c0_31 = arith.constant 0 : index
    %c0_32 = arith.constant 0 : index
    %44 = vector.load %arg14[%c0_31, %c0_32] : memref<32x1024xf32, #tpu.memory_space<vmem>>, vector<32x1024xf32>
    %cst_33 = arith.constant dense<0.000000e+00> : vector<16x1024xf32>
    %45 = tpu.matmul %14, %44, %cst_33 {dimension_numbers = #tpu.dot_dimension_numbers<[1], [0], [0], [1], [0, 0, 1, 1], [], []>} : vector<16x32xf32>, vector<32x1024xf32>, vector<16x1024xf32> -> vector<16x1024xf32>
    %46 = arith.mulf %45, %43 : vector<16x1024xf32>
    %c0_34 = arith.constant 0 : index
    %c0_35 = arith.constant 0 : index
    %47 = vector.load %arg15[%c0_34, %c0_35] : memref<1024x32xf32, #tpu.memory_space<vmem>>, vector<1024x32xf32>
    %cst_36 = arith.constant dense<0.000000e+00> : vector<16x32xf32>
    %48 = tpu.matmul %46, %47, %cst_36 {dimension_numbers = #tpu.dot_dimension_numbers<[1], [0], [0], [1], [0, 0, 1, 1], [], []>} : vector<16x1024xf32>, vector<1024x32xf32>, vector<16x32xf32> -> vector<16x32xf32>
    %49 = tpu.iota {dimensions = array<i32: 0>} : vector<8x16xi32>
    %c0_37 = arith.constant 0 : index
    %c0_38 = arith.constant 0 : index
    %50 = vector.load %arg3[%c0_37, %c0_38] : memref<1x16xi32, #tpu.memory_space<vmem>>, vector<1x16xi32>
    %51 = vector.broadcast %50 : vector<1x16xi32> to vector<8x16xi32>
    %52 = arith.cmpi eq, %49, %51 : vector<8x16xi32>
    %53 = arith.extui %52 : vector<8x16xi1> to vector<8x16xi32>
    %54 = arith.sitofp %53 : vector<8x16xi32> to vector<8x16xf32>
    %cst_39 = arith.constant dense<0.000000e+00> : vector<8x32xf32>
    %55 = tpu.matmul %54, %48, %cst_39 {dimension_numbers = #tpu.dot_dimension_numbers<[1], [0], [0], [1], [0, 0, 1, 1], [], []>} : vector<8x16xf32>, vector<16x32xf32>, vector<8x32xf32> -> vector<8x32xf32>
    %cst_40 = arith.constant dense<0.000000e+00> : vector<8xf32>
    %56 = vector.multi_reduction <add>, %54, %cst_40 [1] : vector<8x16xf32> to vector<8xf32>
    %57 = vector.shape_cast %56 : vector<8xf32> to vector<8x1xf32>
    %cst_41 = arith.constant 1.000000e+00 : f32
    %58 = vector.broadcast %cst_41 : f32 to vector<8x1xf32>
    %59 = arith.maximumf %57, %58 : vector<8x1xf32>
    %60 = vector.broadcast %59 : vector<8x1xf32> to vector<8x32xf32>
    %61 = arith.divf %55, %60 : vector<8x32xf32>
    %c0_42 = arith.constant 0 : index
    %c0_43 = arith.constant 0 : index
    %62 = vector.load %arg16[%c0_42, %c0_43] : memref<1x32xf32, #tpu.memory_space<vmem>>, vector<1x32xf32>
    %63 = vector.broadcast %62 : vector<1x32xf32> to vector<8x32xf32>
    %64 = arith.addf %61, %63 : vector<8x32xf32>
    %cst_44 = arith.constant 0.000000e+00 : f32
    %65 = vector.broadcast %cst_44 : f32 to vector<8x32xf32>
    %66 = arith.maximumf %64, %65 : vector<8x32xf32>
    %c0_45 = arith.constant 0 : index
    %c0_46 = arith.constant 0 : index
    %67 = vector.load %arg17[%c0_45, %c0_46] : memref<96x32xf32, #tpu.memory_space<vmem>>, vector<32x32xf32>
    %c32 = arith.constant 32 : index
    %c0_47 = arith.constant 0 : index
    %68 = vector.load %arg17[%c32, %c0_47] : memref<96x32xf32, #tpu.memory_space<vmem>>, vector<32x32xf32>
    %c64 = arith.constant 64 : index
    %c0_48 = arith.constant 0 : index
    %69 = vector.load %arg17[%c64, %c0_48] : memref<96x32xf32, #tpu.memory_space<vmem>>, vector<32x32xf32>
    %c0_49 = arith.constant 0 : index
    %c0_50 = arith.constant 0 : index
    %70 = vector.load %arg18[%c0_49, %c0_50] : memref<96x32xf32, #tpu.memory_space<vmem>>, vector<32x32xf32>
    %c32_51 = arith.constant 32 : index
    %c0_52 = arith.constant 0 : index
    %71 = vector.load %arg18[%c32_51, %c0_52] : memref<96x32xf32, #tpu.memory_space<vmem>>, vector<32x32xf32>
    %c64_53 = arith.constant 64 : index
    %c0_54 = arith.constant 0 : index
    %72 = vector.load %arg18[%c64_53, %c0_54] : memref<96x32xf32, #tpu.memory_space<vmem>>, vector<32x32xf32>
    %cst_55 = arith.constant dense<0.000000e+00> : vector<8x32xf32>
    %73 = tpu.matmul %66, %67, %cst_55 {dimension_numbers = #tpu.dot_dimension_numbers<[1], [0], [0], [1], [0, 0, 1, 1], [], []>} : vector<8x32xf32>, vector<32x32xf32>, vector<8x32xf32> -> vector<8x32xf32>
    %cst_56 = arith.constant dense<0.000000e+00> : vector<8x32xf32>
    %74 = tpu.matmul %7, %70, %cst_56 {dimension_numbers = #tpu.dot_dimension_numbers<[1], [0], [0], [1], [0, 0, 1, 1], [], []>} : vector<8x32xf32>, vector<32x32xf32>, vector<8x32xf32> -> vector<8x32xf32>
    %75 = arith.addf %73, %74 : vector<8x32xf32>
    %c0_57 = arith.constant 0 : index
    %c0_58 = arith.constant 0 : index
    %76 = vector.load %arg19[%c0_57, %c0_58] : memref<1x32xf32, #tpu.memory_space<vmem>>, vector<1x32xf32>
    %77 = vector.broadcast %76 : vector<1x32xf32> to vector<8x32xf32>
    %78 = arith.addf %75, %77 : vector<8x32xf32>
    %79 = arith.negf %78 : vector<8x32xf32>
    %80 = math.exp %79 : vector<8x32xf32>
    %cst_59 = arith.constant 1.000000e+00 : f32
    %81 = vector.broadcast %cst_59 : f32 to vector<8x32xf32>
    %82 = arith.addf %81, %80 : vector<8x32xf32>
    %83 = arith.divf %81, %82 : vector<8x32xf32>
    %cst_60 = arith.constant dense<0.000000e+00> : vector<8x32xf32>
    %84 = tpu.matmul %66, %68, %cst_60 {dimension_numbers = #tpu.dot_dimension_numbers<[1], [0], [0], [1], [0, 0, 1, 1], [], []>} : vector<8x32xf32>, vector<32x32xf32>, vector<8x32xf32> -> vector<8x32xf32>
    %cst_61 = arith.constant dense<0.000000e+00> : vector<8x32xf32>
    %85 = tpu.matmul %7, %71, %cst_61 {dimension_numbers = #tpu.dot_dimension_numbers<[1], [0], [0], [1], [0, 0, 1, 1], [], []>} : vector<8x32xf32>, vector<32x32xf32>, vector<8x32xf32> -> vector<8x32xf32>
    %86 = arith.addf %84, %85 : vector<8x32xf32>
    %c0_62 = arith.constant 0 : index
    %c0_63 = arith.constant 0 : index
    %87 = vector.load %arg20[%c0_62, %c0_63] : memref<1x32xf32, #tpu.memory_space<vmem>>, vector<1x32xf32>
    %88 = vector.broadcast %87 : vector<1x32xf32> to vector<8x32xf32>
    %89 = arith.addf %86, %88 : vector<8x32xf32>
    %90 = arith.negf %89 : vector<8x32xf32>
    %91 = math.exp %90 : vector<8x32xf32>
    %cst_64 = arith.constant 1.000000e+00 : f32
    %92 = vector.broadcast %cst_64 : f32 to vector<8x32xf32>
    %93 = arith.addf %92, %91 : vector<8x32xf32>
    %94 = arith.divf %92, %93 : vector<8x32xf32>
    %cst_65 = arith.constant dense<0.000000e+00> : vector<8x32xf32>
    %95 = tpu.matmul %66, %69, %cst_65 {dimension_numbers = #tpu.dot_dimension_numbers<[1], [0], [0], [1], [0, 0, 1, 1], [], []>} : vector<8x32xf32>, vector<32x32xf32>, vector<8x32xf32> -> vector<8x32xf32>
    %c0_66 = arith.constant 0 : index
    %c0_67 = arith.constant 0 : index
    %96 = vector.load %arg21[%c0_66, %c0_67] : memref<1x32xf32, #tpu.memory_space<vmem>>, vector<1x32xf32>
    %97 = vector.broadcast %96 : vector<1x32xf32> to vector<8x32xf32>
    %98 = arith.addf %95, %97 : vector<8x32xf32>
    %cst_68 = arith.constant dense<0.000000e+00> : vector<8x32xf32>
    %99 = tpu.matmul %7, %72, %cst_68 {dimension_numbers = #tpu.dot_dimension_numbers<[1], [0], [0], [1], [0, 0, 1, 1], [], []>} : vector<8x32xf32>, vector<32x32xf32>, vector<8x32xf32> -> vector<8x32xf32>
    %c0_69 = arith.constant 0 : index
    %c0_70 = arith.constant 0 : index
    %100 = vector.load %arg22[%c0_69, %c0_70] : memref<1x32xf32, #tpu.memory_space<vmem>>, vector<1x32xf32>
    %101 = vector.broadcast %100 : vector<1x32xf32> to vector<8x32xf32>
    %102 = arith.addf %99, %101 : vector<8x32xf32>
    %103 = arith.mulf %83, %102 : vector<8x32xf32>
    %104 = arith.addf %98, %103 : vector<8x32xf32>
    %105 = math.tanh %104 : vector<8x32xf32>
    %cst_71 = arith.constant 1.000000e+00 : f32
    %106 = vector.broadcast %cst_71 : f32 to vector<8x32xf32>
    %107 = arith.subf %106, %94 : vector<8x32xf32>
    %108 = arith.mulf %107, %105 : vector<8x32xf32>
    %109 = arith.mulf %94, %7 : vector<8x32xf32>
    %110 = arith.addf %108, %109 : vector<8x32xf32>
    %cst_72 = arith.constant 0.000000e+00 : f32
    %111 = vector.broadcast %cst_72 : f32 to vector<8x32xf32>
    %112 = arith.maximumf %110, %111 : vector<8x32xf32>
    %c0_73 = arith.constant 0 : index
    %c0_74 = arith.constant 0 : index
    %113 = vector.load %arg23[%c0_73, %c0_74] : memref<8x32xf32, #tpu.memory_space<vmem>>, vector<8x32xf32>
    tpu.vector_store %arg23[%c0_73, %c0_74], %112 {strides = array<i32>} : memref<8x32xf32, #tpu.memory_space<vmem>>, vector<8x32xf32>,
    return
  }
  func.func @transform_0(%arg0: i32) -> (i32, i32) {
    %c0_i32 = arith.constant 0 : i32
    %c0_i32_0 = arith.constant 0 : i32
    %c0_i32_1 = arith.constant 0 : i32
    return %c0_i32, %c0_i32_0 : i32, i32
  }
  func.func @transform_1(%arg0: i32) -> (i32, i32) {
    %c0_i32 = arith.constant 0 : i32
    %c0_i32_0 = arith.constant 0 : i32
    %c0_i32_1 = arith.constant 0 : i32
    return %c0_i32, %c0_i32_0 : i32, i32
  }
  func.func @transform_2(%arg0: i32) -> (i32, i32) {
    %c0_i32 = arith.constant 0 : i32
    %c0_i32_0 = arith.constant 0 : i32
    %c0_i32_1 = arith.constant 0 : i32
    return %c0_i32, %c0_i32_0 : i32, i32
  }
  func.func @transform_3(%arg0: i32) -> (i32, i32) {
    %c0_i32 = arith.constant 0 : i32
    %c0_i32_0 = arith.constant 0 : i32
    %c0_i32_1 = arith.constant 0 : i32
    return %c0_i32, %c0_i32_0 : i32, i32
  }
  func.func @transform_4(%arg0: i32) -> (i32, i32) {
    %c0_i32 = arith.constant 0 : i32
    %c0_i32_0 = arith.constant 0 : i32
    %c0_i32_1 = arith.constant 0 : i32
    return %c0_i32, %c0_i32_0 : i32, i32
  }
  func.func @transform_5(%arg0: i32) -> (i32, i32) {
    %c0_i32 = arith.constant 0 : i32
    %c0_i32_0 = arith.constant 0 : i32
    %c0_i32_1 = arith.constant 0 : i32
    return %c0_i32, %c0_i32_0 : i32, i32
  }
  func.func @transform_6(%arg0: i32) -> (i32, i32) {
    %c0_i32 = arith.constant 0 : i32
    %c0_i32_0 = arith.constant 0 : i32
    %c0_i32_1 = arith.constant 0 : i32
    return %c0_i32, %c0_i32_0 : i32, i32
  }
  func.func @transform_7(%arg0: i32) -> (i32, i32) {
    %c0_i32 = arith.constant 0 : i32
    %c0_i32_0 = arith.constant 0 : i32
    %c0_i32_1 = arith.constant 0 : i32
    return %c0_i32, %c0_i32_0 : i32, i32
  }
  func.func @transform_8(%arg0: i32) -> (i32, i32) {
    %c0_i32 = arith.constant 0 : i32
    %c0_i32_0 = arith.constant 0 : i32
    %c0_i32_1 = arith.constant 0 : i32
    return %c0_i32, %c0_i32_0 : i32, i32
  }
  func.func @transform_9(%arg0: i32) -> (i32, i32) {
    %c0_i32 = arith.constant 0 : i32
    %c0_i32_0 = arith.constant 0 : i32
    %c0_i32_1 = arith.constant 0 : i32
    return %c0_i32, %c0_i32_0 : i32, i32
  }
  func.func @transform_10(%arg0: i32) -> (i32, i32) {
    %c0_i32 = arith.constant 0 : i32
    %c0_i32_0 = arith.constant 0 : i32
    %c0_i32_1 = arith.constant 0 : i32
    return %c0_i32, %c0_i32_0 : i32, i32
  }
  func.func @transform_11(%arg0: i32) -> (i32, i32) {
    %c0_i32 = arith.constant 0 : i32
    %c0_i32_0 = arith.constant 0 : i32
    %c0_i32_1 = arith.constant 0 : i32
    return %c0_i32, %c0_i32_0 : i32, i32
  }
  func.func @transform_12(%arg0: i32) -> (i32, i32) {
    %c0_i32 = arith.constant 0 : i32
    %c0_i32_0 = arith.constant 0 : i32
    %c0_i32_1 = arith.constant 0 : i32
    return %c0_i32, %c0_i32_0 : i32, i32
  }
  func.func @transform_13(%arg0: i32) -> (i32, i32) {
    %c0_i32 = arith.constant 0 : i32
    %c0_i32_0 = arith.constant 0 : i32
    %c0_i32_1 = arith.constant 0 : i32
    return %c0_i32, %c0_i32_0 : i32, i32
  }
  func.func @transform_14(%arg0: i32) -> (i32, i32) {
    %c0_i32 = arith.constant 0 : i32
    %c0_i32_0 = arith.constant 0 : i32
    %c0_i32_1 = arith.constant 0 : i32
    return %c0_i32, %c0_i32_0 : i32, i32
  }
  func.func @transform_15(%arg0: i32) -> (i32, i32) {
    %c0_i32 = arith.constant 0 : i32
    %c0_i32_0 = arith.constant 0 : i32
    %c0_i32_1 = arith.constant 0 : i32
    return %c0_i32, %c0_i32_0 : i32, i32
  }
  func.func @transform_16(%arg0: i32) -> (i32, i32) {
    %c0_i32 = arith.constant 0 : i32
    %c0_i32_0 = arith.constant 0 : i32
    %c0_i32_1 = arith.constant 0 : i32
    return %c0_i32, %c0_i32_0 : i32, i32
  }
  func.func @transform_17(%arg0: i32) -> (i32, i32) {
    %c0_i32 = arith.constant 0 : i32
    %c0_i32_0 = arith.constant 0 : i32
    %c0_i32_1 = arith.constant 0 : i32
    return %c0_i32, %c0_i32_0 : i32, i32
  }
  func.func @transform_18(%arg0: i32) -> (i32, i32) {
    %c0_i32 = arith.constant 0 : i32
    %c0_i32_0 = arith.constant 0 : i32
    %c0_i32_1 = arith.constant 0 : i32
    return %c0_i32, %c0_i32_0 : i32, i32
  }
  func.func @transform_19(%arg0: i32) -> (i32, i32) {
    %c0_i32 = arith.constant 0 : i32
    %c0_i32_0 = arith.constant 0 : i32
    %c0_i32_1 = arith.constant 0 : i32
    return %c0_i32, %c0_i32_0 : i32, i32
  }
  func.func @transform_20(%arg0: i32) -> (i32, i32) {
    %c0_i32 = arith.constant 0 : i32
    %c0_i32_0 = arith.constant 0 : i32
    %c0_i32_1 = arith.constant 0 : i32
    return %c0_i32, %c0_i32_0 : i32, i32
  }
  func.func @transform_21(%arg0: i32) -> (i32, i32) {
    %c0_i32 = arith.constant 0 : i32
    %c0_i32_0 = arith.constant 0 : i32
    %c0_i32_1 = arith.constant 0 : i32
    return %c0_i32, %c0_i32_0 : i32, i32
  }
  func.func @transform_22(%arg0: i32) -> (i32, i32) {
    %c0_i32 = arith.constant 0 : i32
    %c0_i32_0 = arith.constant 0 : i32
    %c0_i32_1 = arith.constant 0 : i32
    return %c0_i32, %c0_i32_0 : i32, i32
  }
}

</mosaic_0001>

<bundles_post_ra>
// kernel: encoder_forward.1
= control target key start
LH: loop header
LB: loop body
LE: loop exit
PB: predicated region body
PF: predicated region fallthrough
CT: control target
= control target key end

     0   :  { %s5000_s0 = inlined_call_operand.vmem [shape: f32[8,16], index: 0, kind: input, shape index: {}]   ;;  %s5001_s1 = inlined_call_operand.vmem [shape: s32[16,1], index: 1, kind: input, shape index: {}]   ;;  %s5002_s2 = inlined_call_operand.vmem [shape: s32[1,16], index: 2, kind: input, shape index: {}]   ;;  %s5003_s3 = inlined_call_operand.vmem [shape: f32[1,8], index: 3, kind: input, shape index: {}]   ;;  %s5004_s4 = inlined_call_operand.vmem [shape: f32[16,4], index: 4, kind: input, shape index: {}]   ;;  %s5005_s5 = inlined_call_operand.vmem [shape: f32[16,32], index: 5, kind: input, shape index: {}]   ;;  %s5006_s6 = inlined_call_operand.vmem [shape: f32[1,32], index: 6, kind: input, shape index: {}]   ;;  %s5007_s7 = inlined_call_operand.vmem [shape: f32[32,1024], index: 7, kind: input, shape index: {}]   ;;  %s5008_s8 = inlined_call_operand.vmem [shape: f32[4,1024], index: 8, kind: input, shape index: {}]   ;;  %s5009_s9 = inlined_call_operand.vmem [shape: f32[1,1024], index: 9, kind: input, shape index: {}]   ;;  %s5010_s10 = inlined_call_operand.vmem [shape: f32[4,1024], index: 10, kind: input, shape index: {}]   ;;  %s5011_s11 = inlined_call_operand.vmem [shape: f32[32,1024], index: 11, kind: input, shape index: {}]   ;;  %s5012_s12 = inlined_call_operand.vmem [shape: f32[1,1024], index: 12, kind: input, shape index: {}]   ;;  %s5013_s13 = inlined_call_operand.vmem [shape: f32[32,1024], index: 13, kind: input, shape index: {}]   ;;  %s5014_s14 = inlined_call_operand.vmem [shape: f32[1024,32], index: 14, kind: input, shape index: {}]   ;;  %s5015_s15 = inlined_call_operand.vmem [shape: f32[1,32], index: 15, kind: input, shape index: {}]   ;;  %s5016_s16 = inlined_call_operand.vmem [shape: f32[96,32], index: 16, kind: input, shape index: {}]   ;;  %s5017_s17 = inlined_call_operand.vmem [shape: f32[96,32], index: 17, kind: input, shape index: {}]   ;;  %s5018_s18 = inlined_call_operand.vmem [shape: f32[1,32], index: 18, kind: input, shape index: {}]   ;;  %s5019_s19 = inlined_call_operand.vmem [shape: f32[1,32], index: 19, kind: input, shape index: {}]   ;;  %s5020_s20 = inlined_call_operand.vmem [shape: f32[1,32], index: 20, kind: input, shape index: {}]   ;;  %s5021_s21 = inlined_call_operand.vmem [shape: f32[1,32], index: 21, kind: input, shape index: {}]   ;;  %s5022_s22 = inlined_call_operand.hbm [shape: f32[8,32], index: 22, kind: output, shape index: {}]  }
   0x1   :  { %5030 = sst [smem:[#allocation23_spill]] %s5000_s0 }
   0x2   :  { %5031 = sst [smem:[#allocation24_spill]] %s5001_s1 }
   0x3   :  { %5032 = sst [smem:[#allocation25_spill]] %s5002_s2 }
   0x4   :  { %5033 = sst [smem:[#allocation26_spill]] %s5003_s3 }
   0x5   :  { %5034 = sst [smem:[#allocation27_spill]] %s5004_s4 }
   0x6   :  { %5035 = sst [smem:[#allocation28_spill]] %s5005_s5 }
   0x7   :  { %5036 = sst [smem:[#allocation29_spill]] %s5006_s6 }
   0x8   :  { %s5037_s29 = sld [smem:[#allocation28_spill]]  ;;  %v5026_v1 = vmov 0.0   ;;  %vm3605_vm0 = vmmov 0  }
   0x9   :  { %3472 = vmatprep.subr.mxu0 %v5026_v1  ;;  %3476 = vmatprep.mubr.msk.f32.mxu0 %vm3605_vm0, %v5026_v1  ;;  %s5038_s1 = sld [smem:[#allocation24_spill]] }
   0xe   :  { %v74_v0 = vld [vmem:[%s5037_s29 + $0x8] sm:$0xff]  ;;  %v73_v2 = vld [vmem:[%s5037_s29] sm:$0xff] }
   0xf   :  { %v159_v3 = vld [vmem:[%s5038_s1] sm:$0xff] }
  0x10   :  { %27 = vsyncpa [#allocation3], 0  ;;  %3473 = vmatpush3.msra.mxu0 %v74_v0  ;;  %s5039_s6 = sld [smem:[#allocation23_spill]]  ;;  %vm82_vm1 = vcmask 130048   ;;  %v3606_v5 = vmov 0   ;;  %v160_v6 = vld [vmem:[%s5038_s1 + $0x8] sm:$0xff]  ;;  %404 = vmatprep.mubr.f32.mxu1 %v5026_v1  ;;  %v157_v7 = vlaneseq }
  0x11   :  { %3561 = vset.pattern.permute.xlu0 %v3606_v5  ;;  %3474 = vmatprep.subr.mxu0 %v5026_v1  ;;  %s5040_s3 = sld [smem:[#allocation26_spill]]  ;;  %vm173_vm3 = vcmask 64512   ;;  %v304_v18 = vld [vmem:[%s5008_s8] sm:$0xff]  ;;  %vm323_vm5 = vcmask 1043456   ;;  %v306_v20 = vld [vmem:[%s5008_s8 + $0x10] sm:$0xff]  ;;  %vm316_vm6 = vcmask 31744  }
  0x12   :  { %162 = vperm.xlu0 %3561, %v159_v3   ;;  %3475 = vmatpush3.msra.mxu0 %v73_v2  ;;  %v158_v8 = vand.u32 127, %v157_v7  ;;  %v312_v19 = vcombine.high %v304_v18, %v304_v18  ;;  %s5041_s1 = sld [smem:[#allocation27_spill]]  ;;  %v314_v22 = vcombine.high %v306_v20, %v306_v20  ;;  %v297_v23 = vld [vmem:[%s5007_s7 + $0xc8] sm:$0xff]  ;;  %v296_v25 = vld [vmem:[%s5007_s7 + $0xc0] sm:$0xff]  ;;  %v307_v34 = vld [vmem:[%s5008_s8 + $0x18] sm:$0xff]  ;;  %vm648_vm7 = vcmask 261120  }
  0x13   :  { %v289_v26 = vld [vmem:[%s5007_s7 + $0x88] sm:$0xff]  ;;  %v288_v27 = vld [vmem:[%s5007_s7 + $0x80] sm:$0xff]  ;;  %v315_v37 = vcombine.high %v307_v34, %v307_v34  ;;  %v299_v38 = vld [vmem:[%s5007_s7 + $0xd8] sm:$0xff]  ;;  %s5080_s26 = sld [smem:[#allocation25_spill]] }
  0x14   :  { %3209 = vmatprep.subr.msk.mxu1 %vm323_vm5, %v312_v19  ;;  %v281_v28 = vld [vmem:[%s5007_s7 + $0x48] sm:$0xff]  ;;  %v298_v39 = vld [vmem:[%s5007_s7 + $0xd0] sm:$0xff]  ;;  %v291_v40 = vld [vmem:[%s5007_s7 + $0x98] sm:$0xff] }
  0x15   :  { %3210 = vmatpush1.msk.msra.mxu1 %vm323_vm5, %v304_v18  ;;  %v305_v31 = vld [vmem:[%s5008_s8 + $0x8] sm:$0xff]  ;;  %v290_v41 = vld [vmem:[%s5007_s7 + $0x90] sm:$0xff]  ;;  %v283_v42 = vld [vmem:[%s5007_s7 + $0x58] sm:$0xff] }
  0x16   :  { %v72_v4 = vld [vmem:[%s5039_s6] sm:$0xff]  ;;  %165 = vperm.xlu0 %3561, %v160_v6   ;;  %3217 = vmatprep.subr.msk.mxu1 %vm323_vm5, %v314_v22  ;;  %v313_v36 = vcombine.high %v305_v31, %v305_v31  ;;  %v282_v44 = vld [vmem:[%s5007_s7 + $0x50] sm:$0xff]  ;;  %v273_v45 = vld [vmem:[%s5007_s7 + $0x8] sm:$0xff] }
  0x17   :  { %3477 = vmatmul.mubr.msk.f32.vlgmr.msra.gmra.mxu0 %vm82_vm1, %v72_v4  ;;  %v3208_v10 = vld [vmem:[%s5040_s3] ss:$0 sm:$0xff]  ;;  %v275_v46 = vld [vmem:[%s5007_s7 + $0x18] sm:$0xff]  ;;  %v274_v48 = vld [vmem:[%s5007_s7 + $0x10] sm:$0xff] }
  0x18   :  { %v3762_v21 = vld [vmem:[%s5041_s1] sm:$0xff]  ;;  %v3776_v24 = vld [vmem:[%s5041_s1 + $0x8] sm:$0xff]  ;;  %s5042_s1 = sld [smem:[#allocation29_spill]]  ;;  %v303_v50 = vld [vmem:[%s5007_s7 + $0xf8] sm:$0xff] }
  0x19   :  { %3211 = vmatmul.mubr.msk.f32.vlgmr.msra.gmra.mxu1 %vm316_vm6, %v3762_v21  ;;  %v280_v43 = vld [vmem:[%s5007_s7 + $0x40] sm:$0xff]  ;;  %v301_v49 = vld [vmem:[%s5007_s7 + $0xe8] sm:$0xff]  ;;  %v302_v53 = vld [vmem:[%s5007_s7 + $0xf0] sm:$0xff] }
  0x1a   :  { %410 = vmatprep.mubr.f32.mxu1 %v5026_v1  ;;  %3218 = vmatpush1.msk.msra.mxu1 %vm323_vm5, %v306_v20  ;;  %v272_v47 = vld [vmem:[%s5007_s7] sm:$0xff]  ;;  %v293_v55 = vld [vmem:[%s5007_s7 + $0xa8] sm:$0xff]  ;;  %v295_v56 = vld [vmem:[%s5007_s7 + $0xb8] sm:$0xff] }
  0x1b   :  { %679 = vmatprep.subr.mxu1 %v297_v23  ;;  %v300_v52 = vld [vmem:[%s5007_s7 + $0xe0] sm:$0xff]  ;;  %v294_v58 = vld [vmem:[%s5007_s7 + $0xb0] sm:$0xff]  ;;  %v285_v59 = vld [vmem:[%s5007_s7 + $0x68] sm:$0xff] }
  0x1c   :  { %v292_v57 = vld [vmem:[%s5007_s7 + $0xa0] sm:$0xff]  ;;  %v287_v60 = vld [vmem:[%s5007_s7 + $0x78] sm:$0xff]  ;;  %v286_v62 = vld [vmem:[%s5007_s7 + $0x70] sm:$0xff] }
  0x1d   :  { %3212 = vmatmul.mubr.msk.f32.gmra.mxu1 %vm316_vm6, %v3776_v24  ;;  %v284_v61 = vld [vmem:[%s5007_s7 + $0x60] sm:$0xff]  ;;  %v277_v63 = vld [vmem:[%s5007_s7 + $0x28] sm:$0xff]  ;;  %v279_v0 = vld [vmem:[%s5007_s7 + $0x38] sm:$0xff] }
  0x1e   :  { %558 = vmatprep.mubr.f32.mxu1 %v5026_v1  ;;  %v3202_v29 = vld [vmem:[%s5042_s1] ss:$0 sm:$0xff]  ;;  %v278_v3 = vld [vmem:[%s5007_s7 + $0x30] sm:$0xff]  ;;  %v1050_v4 = vld [vmem:[%s5011_s11 + $0xc8] sm:$0xff] }
  0x1f   :  { %v276_v2 = vld [vmem:[%s5007_s7 + $0x20] sm:$0xff]  ;;  %v1052_v5 = vld [vmem:[%s5011_s11 + $0xd8] sm:$0xff]  ;;  %v1027_v20 = vld [vmem:[%s5011_s11 + $0x10] sm:$0xff] }
  0x20   :  { %v1049_v6 = vld [vmem:[%s5011_s11 + $0xc0] sm:$0xff]  ;;  %v1028_v18 = vld [vmem:[%s5011_s11 + $0x18] sm:$0xff]  ;;  %v1054_v22 = vld [vmem:[%s5011_s11 + $0xe8] sm:$0xff] }
  0x21   :  { %3219 = vmatmul.mubr.msk.f32.vlgmr.msra.gmra.mxu1 %vm316_vm6, %v3762_v21  ;;  %v1025_v19 = vld [vmem:[%s5011_s11] sm:$0xff]  ;;  %v1056_v23 = vld [vmem:[%s5011_s11 + $0xf8] sm:$0xff] }
  0x22   :  { %564 = vmatprep.mubr.f32.mxu1 %v5026_v1  ;;  %680 = vmatpush1.msra.mxu1 %v296_v25  ;;  %v1053_v25 = vld [vmem:[%s5011_s11 + $0xe0] sm:$0xff] }
  0x23   :  { %681 = vmatprep.subr.mxu1 %v289_v26  ;;  %v1055_v26 = vld [vmem:[%s5011_s11 + $0xf0] sm:$0xff] }
  0x24   :  { %682 = vmatpush1.msra.mxu1 %v288_v27  ;;  %v1046_v27 = vld [vmem:[%s5011_s11 + $0xa8] sm:$0xff] }
  0x25   :  { %3220 = vmatmul.mubr.msk.f32.gmra.mxu1 %vm316_vm6, %v3776_v24  ;;  %683 = vmatprep.subr.mxu1 %v281_v28  ;;  %v1048_v28 = vld [vmem:[%s5011_s11 + $0xb8] sm:$0xff] }
  0x26   :  { %719 = vmatprep.mubr.f32.mxu1 %v5026_v1  ;;  %684 = vmatpush1.msra.mxu1 %v280_v43 }
  0x27   :  { %685 = vmatprep.subr.mxu1 %v273_v45  ;;  %v1024_v45 = vld [vmem:[%s5010_s10 + $0x18] sm:$0xff] }
  0x28   :  { %686 = vmatpush1.msra.mxu1 %v272_v47  ;;  %v1372_v47 = vcombine.high %v1024_v45, %v1024_v45 }
  0x29   :  { %833 = vmatprep.subr.mxu1 %v301_v49  ;;  %v1832_v49 = vld [vmem:[%s5013_s13 + $0xd8] sm:$0xff] }
  0x8d   :  { %v163_v9 = vpop.permute.xlu0 %162 }
  0x8e   :  { %vm167_vm2 = vcmp.eq.s32.totalorder %v158_v8, %v163_v9  ;;  %v1042_v9 = vld [vmem:[%s5011_s11 + $0x88] sm:$0xff] }
  0x8f   :  { %v3204_v11 = vsel %vm167_vm2, 1.0, %v5026_v1 }
  0x90   :  { %v262_v12 = vmul.f32 %v3208_v10, %v3204_v11  ;;  %3481 = vmatprep.mubr.msk.f32.mxu0 %vm173_vm3, %v3204_v11  ;;  %v1041_v11 = vld [vmem:[%s5011_s11 + $0x80] sm:$0xff] }
  0x91   :  { %v166_v13 = vpop.permute.xlu0 %165 }
  0x92   :  { %vm168_vm4 = vcmp.eq.s32.totalorder %v158_v8, %v166_v13  ;;  %v264_v14 = vsel %vm173_vm3, %v262_v12, 0.0  ;;  %v1051_v8 = vld [vmem:[%s5011_s11 + $0xd0] sm:$0xff]  ;;  %v1034_v13 = vld [vmem:[%s5011_s11 + $0x48] sm:$0xff] }
  0x93   :  { %v3205_v15 = vsel %vm168_vm4, 1.0, %v5026_v1  ;;  %265 = vadd.xlane.f32.xlu1 %v264_v14  ;;  %v1043_v12 = vld [vmem:[%s5011_s11 + $0x90] sm:$0xff]  ;;  %v1036_v14 = vld [vmem:[%s5011_s11 + $0x58] sm:$0xff] }
  0x94   :  { %v263_v16 = vmul.f32 %v3208_v10, %v3205_v15  ;;  %v1044_v10 = vld [vmem:[%s5011_s11 + $0x98] sm:$0xff] }
  0x96   :  { %v267_v17 = vsel %vm173_vm3, %v263_v16, 0.0  ;;  %v1035_v16 = vld [vmem:[%s5011_s11 + $0x50] sm:$0xff] }
  0x97   :  { %268 = vadd.xlane.f32.xlu1 %v267_v17  ;;  %v1026_v17 = vld [vmem:[%s5011_s11 + $0x8] sm:$0xff] }
  0xd7   :  { %v152_v30 = vpop.f32.mrf.mxu0 }
  0xd8   :  { %v153_v32 = vadd.f32 %v3202_v29, %v152_v30  ;;  %v1045_v29 = vld [vmem:[%s5011_s11 + $0xa0] sm:$0xff]  ;;  %v1047_v30 = vld [vmem:[%s5011_s11 + $0xb0] sm:$0xff] }
  0xd9   :  { %v3478_v33 = vpop.f32.mrf.mxu0 }
  0xda   :  { %v3809_v35 = vmax.f32 %v153_v32, 0.0  ;;  %v1040_v32 = vld [vmem:[%s5011_s11 + $0x78] sm:$0xff]  ;;  %v1037_v33 = vld [vmem:[%s5011_s11 + $0x60] sm:$0xff] }
  0xdc   :  { %5043 = vst [vmem:[#allocation5_spill] sm:$0xff] %v3809_v35  ;;  %3479 = vmatprep.subr.mxu0 %v3809_v35 }
  0xdd   :  { %3480 = vmatpush3.msra.mxu0 %v3809_v35 }
  0xde   :  { %3482 = vmatmul.mubr.msk.f32.vlgmr.msra.gmra.mxu0 %vm173_vm3, %v3205_v15  ;;  %3213 = vmatprep.subr.msk.mxu0 %vm323_vm5, %v313_v36  ;;  %v1033_v15 = vld [vmem:[%s5011_s11 + $0x40] sm:$0xff]  ;;  %v1030_v36 = vld [vmem:[%s5011_s11 + $0x28] sm:$0xff] }
  0xdf   :  { %3214 = vmatpush1.msk.msra.mxu0 %vm323_vm5, %v305_v31  ;;  %481 = vmatprep.mubr.f32.mxu0 %v5026_v1  ;;  %v1038_v31 = vld [vmem:[%s5011_s11 + $0x68] sm:$0xff] }
  0xe0   :  { %3221 = vmatprep.subr.msk.mxu0 %vm323_vm5, %v315_v37  ;;  %v1032_v37 = vld [vmem:[%s5011_s11 + $0x38] sm:$0xff] }
  0xe2   :  { %3215 = vmatmul.mubr.msk.f32.vlgmr.msra.gmra.mxu0 %vm316_vm6, %v3762_v21 }
  0xe3   :  { %487 = vmatprep.mubr.f32.mxu0 %v5026_v1  ;;  %3222 = vmatpush1.msk.msra.mxu0 %vm323_vm5, %v307_v34  ;;  %v1039_v34 = vld [vmem:[%s5011_s11 + $0x70] sm:$0xff] }
  0xe4   :  { %756 = vmatprep.subr.mxu0 %v299_v38  ;;  %v1029_v38 = vld [vmem:[%s5011_s11 + $0x20] sm:$0xff] }
  0xe6   :  { %3216 = vmatmul.mubr.msk.f32.gmra.mxu0 %vm316_vm6, %v3776_v24 }
  0xe7   :  { %635 = vmatprep.mubr.f32.mxu0 %v5026_v1 }
  0xea   :  { %3223 = vmatmul.mubr.msk.f32.vlgmr.msra.gmra.mxu0 %vm316_vm6, %v3762_v21 }
  0xeb   :  { %757 = vmatpush1.msra.mxu0 %v298_v39  ;;  %641 = vmatprep.mubr.f32.mxu0 %v5026_v1  ;;  %v1021_v39 = vld [vmem:[%s5010_s10] sm:$0xff] }
  0xec   :  { %758 = vmatprep.subr.mxu0 %v291_v40  ;;  %v1022_v40 = vld [vmem:[%s5010_s10 + $0x8] sm:$0xff] }
  0xed   :  { %759 = vmatpush1.msra.mxu0 %v290_v41  ;;  %v1031_v41 = vld [vmem:[%s5011_s11 + $0x30] sm:$0xff]  ;;  %v1370_v43 = vcombine.high %v1022_v40, %v1022_v40 }
  0xee   :  { %3224 = vmatmul.mubr.msk.f32.gmra.mxu0 %vm316_vm6, %v3776_v24  ;;  %760 = vmatprep.subr.mxu0 %v283_v42  ;;  %v1369_v42 = vcombine.high %v1021_v39, %v1021_v39 }
  0xef   :  { %796 = vmatprep.mubr.f32.mxu0 %v5026_v1  ;;  %761 = vmatpush1.msra.mxu0 %v282_v44  ;;  %v1023_v44 = vld [vmem:[%s5010_s10 + $0x10] sm:$0xff] }
  0xf0   :  { %762 = vmatprep.subr.mxu0 %v275_v46  ;;  %v1371_v46 = vcombine.high %v1023_v44, %v1023_v44 }
  0xf1   :  { %763 = vmatpush1.msra.mxu0 %v274_v48  ;;  %v1830_v48 = vld [vmem:[%s5013_s13 + $0xc8] sm:$0xff] }
  0xf2   :  { %910 = vmatprep.subr.mxu0 %v303_v50  ;;  %v1829_v50 = vld [vmem:[%s5013_s13 + $0xc0] sm:$0xff] }
 0x19e   :  { %v3870_v51 = vpop.f32.mrf.mxu0 }
 0x1a0   :  { %v3878_v54 = vpop.f32.mrf.mxu0 }
 0x1a1   :  { %3225 = vmatmul.mubr.msk.f32.vlgmr.msra.gmra.mxu1 %vm648_vm7, %v3878_v54  ;;  %3227 = vmatmul.mubr.msk.f32.vlgmr.msra.gmra.mxu0 %vm648_vm7, %v3878_v54 }
 0x1a2   :  { %834 = vmatpush1.msra.mxu1 %v300_v52  ;;  %911 = vmatpush1.msra.mxu0 %v302_v53  ;;  %v1831_v52 = vld [vmem:[%s5013_s13 + $0xd0] sm:$0xff]  ;;  %v1822_v53 = vld [vmem:[%s5013_s13 + $0x88] sm:$0xff] }
 0x1a3   :  { %835 = vmatprep.subr.mxu1 %v293_v55  ;;  %912 = vmatprep.subr.mxu0 %v295_v56  ;;  %v1824_v55 = vld [vmem:[%s5013_s13 + $0x98] sm:$0xff]  ;;  %v1821_v56 = vld [vmem:[%s5013_s13 + $0x80] sm:$0xff] }
 0x1a4   :  { %725 = vmatprep.mubr.f32.mxu1 %v5026_v1  ;;  %802 = vmatprep.mubr.f32.mxu0 %v5026_v1 }
 0x1a5   :  { %836 = vmatpush1.msra.mxu1 %v292_v57  ;;  %913 = vmatpush1.msra.mxu0 %v294_v58  ;;  %v1823_v57 = vld [vmem:[%s5013_s13 + $0x90] sm:$0xff]  ;;  %v1816_v58 = vld [vmem:[%s5013_s13 + $0x58] sm:$0xff] }
 0x1a6   :  { %3226 = vmatmul.mubr.msk.f32.gmra.mxu1 %vm648_vm7, %v3870_v51  ;;  %3228 = vmatmul.mubr.msk.f32.gmra.mxu0 %vm648_vm7, %v3870_v51 }
 0x1a7   :  { %837 = vmatprep.subr.mxu1 %v285_v59  ;;  %914 = vmatprep.subr.mxu0 %v287_v60  ;;  %v1813_v59 = vld [vmem:[%s5013_s13 + $0x40] sm:$0xff]  ;;  %v1815_v60 = vld [vmem:[%s5013_s13 + $0x50] sm:$0xff] }
 0x1a8   :  { %838 = vmatpush1.msra.mxu1 %v284_v61  ;;  %915 = vmatpush1.msra.mxu0 %v286_v62  ;;  %v1806_v61 = vld [vmem:[%s5013_s13 + $0x8] sm:$0xff]  ;;  %v1808_v62 = vld [vmem:[%s5013_s13 + $0x18] sm:$0xff] }
 0x1a9   :  { %839 = vmatprep.subr.mxu1 %v277_v63  ;;  %916 = vmatprep.subr.mxu0 %v279_v0  ;;  %v1805_v63 = vld [vmem:[%s5013_s13] sm:$0xff]  ;;  %v1834_v0 = vld [vmem:[%s5013_s13 + $0xe8] sm:$0xff] }
 0x1aa   :  { %840 = vmatpush1.msra.mxu1 %v276_v2  ;;  %873 = vmatprep.mubr.f32.mxu1 %v5026_v1  ;;  %v1836_v2 = vld [vmem:[%s5013_s13 + $0xf8] sm:$0xff] }
 0x1ab   :  { %917 = vmatpush1.msra.mxu0 %v278_v3  ;;  %950 = vmatprep.mubr.f32.mxu0 %v5026_v1  ;;  %v1833_v3 = vld [vmem:[%s5013_s13 + $0xe0] sm:$0xff] }
 0x1ac   :  { %3229 = vmatmul.mubr.msk.f32.vlgmr.msra.gmra.mxu1 %vm648_vm7, %v3878_v54  ;;  %3231 = vmatmul.mubr.msk.f32.vlgmr.msra.gmra.mxu0 %vm648_vm7, %v3878_v54 }
 0x1ad   :  { %1081 = vmatprep.subr.mxu1 %v1050_v4  ;;  %1158 = vmatprep.subr.mxu0 %v1052_v5  ;;  %v1835_v4 = vld [vmem:[%s5013_s13 + $0xf0] sm:$0xff]  ;;  %v1826_v5 = vld [vmem:[%s5013_s13 + $0xa8] sm:$0xff] }
 0x1ae   :  { %1082 = vmatpush1.msra.mxu1 %v1049_v6  ;;  %1159 = vmatpush1.msra.mxu0 %v1051_v8  ;;  %v1828_v6 = vld [vmem:[%s5013_s13 + $0xb8] sm:$0xff]  ;;  %v1825_v8 = vld [vmem:[%s5013_s13 + $0xa0] sm:$0xff] }
 0x1af   :  { %1083 = vmatprep.subr.mxu1 %v1042_v9  ;;  %1160 = vmatprep.subr.mxu0 %v1044_v10  ;;  %v1827_v9 = vld [vmem:[%s5013_s13 + $0xb0] sm:$0xff]  ;;  %v1818_v10 = vld [vmem:[%s5013_s13 + $0x68] sm:$0xff] }
 0x1b0   :  { %879 = vmatprep.mubr.f32.mxu1 %v5026_v1  ;;  %956 = vmatprep.mubr.f32.mxu0 %v5026_v1 }
 0x1b1   :  { %1084 = vmatpush1.msra.mxu1 %v1041_v11  ;;  %1161 = vmatpush1.msra.mxu0 %v1043_v12  ;;  %v1820_v11 = vld [vmem:[%s5013_s13 + $0x78] sm:$0xff]  ;;  %v1817_v12 = vld [vmem:[%s5013_s13 + $0x60] sm:$0xff] }
 0x1b2   :  { %3230 = vmatmul.mubr.msk.f32.gmra.mxu1 %vm648_vm7, %v3870_v51  ;;  %3232 = vmatmul.mubr.msk.f32.gmra.mxu0 %vm648_vm7, %v3870_v51 }
 0x1b3   :  { %1085 = vmatprep.subr.mxu1 %v1034_v13  ;;  %1162 = vmatprep.subr.mxu0 %v1036_v14  ;;  %v1819_v13 = vld [vmem:[%s5013_s13 + $0x70] sm:$0xff]  ;;  %v1810_v14 = vld [vmem:[%s5013_s13 + $0x28] sm:$0xff] }
 0x1b4   :  { %1086 = vmatpush1.msra.mxu1 %v1033_v15  ;;  %1163 = vmatpush1.msra.mxu0 %v1035_v16  ;;  %v1812_v15 = vld [vmem:[%s5013_s13 + $0x38] sm:$0xff]  ;;  %v1809_v16 = vld [vmem:[%s5013_s13 + $0x20] sm:$0xff] }
 0x1b5   :  { %1087 = vmatprep.subr.mxu1 %v1026_v17  ;;  %1164 = vmatprep.subr.mxu0 %v1028_v18  ;;  %v1811_v17 = vld [vmem:[%s5013_s13 + $0x30] sm:$0xff]  ;;  %v2192_v18 = vld [vmem:[%s5014_s14 + $0xf8] sm:$0xff] }
 0x1b6   :  { %1088 = vmatpush1.msra.mxu1 %v1025_v19  ;;  %1121 = vmatprep.mubr.f32.mxu1 %v5026_v1  ;;  %v2224_v19 = vld [vmem:[%s5014_s14 + $0x1f8] sm:$0xff] }
 0x1b7   :  { %1165 = vmatpush1.msra.mxu0 %v1027_v20  ;;  %1198 = vmatprep.mubr.f32.mxu0 %v5026_v1  ;;  %v2208_v20 = vld [vmem:[%s5014_s14 + $0x178] sm:$0xff] }
 0x1b8   :  { %3233 = vmatmul.mubr.msk.f32.vlgmr.msra.gmra.mxu1 %vm648_vm7, %v3878_v54  ;;  %3235 = vmatmul.mubr.msk.f32.vlgmr.msra.gmra.mxu0 %vm648_vm7, %v3878_v54 }
 0x1b9   :  { %1235 = vmatprep.subr.mxu1 %v1054_v22  ;;  %1312 = vmatprep.subr.mxu0 %v1056_v23  ;;  %v2223_v22 = vld [vmem:[%s5014_s14 + $0x1f0] sm:$0xff] }
 0x1ba   :  { %1236 = vmatpush1.msra.mxu1 %v1053_v25  ;;  %1313 = vmatpush1.msra.mxu0 %v1055_v26  ;;  %v2175_v23 = vld [vmem:[%s5014_s14 + $0x70] sm:$0xff]  ;;  %v2190_v26 = vld [vmem:[%s5014_s14 + $0xe8] sm:$0xff] }
 0x1bb   :  { %1237 = vmatprep.subr.mxu1 %v1046_v27  ;;  %1314 = vmatprep.subr.mxu0 %v1048_v28  ;;  %v2207_v25 = vld [vmem:[%s5014_s14 + $0x170] sm:$0xff]  ;;  %v2222_v27 = vld [vmem:[%s5014_s14 + $0x1e8] sm:$0xff] }
 0x1bc   :  { %1127 = vmatprep.mubr.f32.mxu1 %v5026_v1  ;;  %1204 = vmatprep.mubr.f32.mxu0 %v5026_v1  ;;  %v2174_v28 = vld [vmem:[%s5014_s14 + $0x68] sm:$0xff] }
 0x1bd   :  { %1238 = vmatpush1.msra.mxu1 %v1045_v29  ;;  %1315 = vmatpush1.msra.mxu0 %v1047_v30  ;;  %v2206_v29 = vld [vmem:[%s5014_s14 + $0x168] sm:$0xff]  ;;  %v2189_v30 = vld [vmem:[%s5014_s14 + $0xe0] sm:$0xff] }
 0x1be   :  { %3234 = vmatmul.mubr.msk.f32.gmra.mxu1 %vm648_vm7, %v3870_v51  ;;  %3236 = vmatmul.mubr.msk.f32.gmra.mxu0 %vm648_vm7, %v3870_v51 }
 0x1bf   :  { %1239 = vmatprep.subr.mxu1 %v1038_v31  ;;  %1316 = vmatprep.subr.mxu0 %v1040_v32  ;;  %v2221_v31 = vld [vmem:[%s5014_s14 + $0x1e0] sm:$0xff] }
 0x1c0   :  { %1240 = vmatpush1.msra.mxu1 %v1037_v33  ;;  %1317 = vmatpush1.msra.mxu0 %v1039_v34  ;;  %v2173_v32 = vld [vmem:[%s5014_s14 + $0x60] sm:$0xff]  ;;  %v2188_v34 = vld [vmem:[%s5014_s14 + $0xd8] sm:$0xff] }
 0x1c1   :  { %1241 = vmatprep.subr.mxu1 %v1030_v36  ;;  %1318 = vmatprep.subr.mxu0 %v1032_v37  ;;  %v2205_v33 = vld [vmem:[%s5014_s14 + $0x160] sm:$0xff]  ;;  %v2220_v36 = vld [vmem:[%s5014_s14 + $0x1d8] sm:$0xff] }
 0x1c2   :  { %1242 = vmatpush1.msra.mxu1 %v1029_v38  ;;  %1275 = vmatprep.mubr.f32.mxu1 %v5026_v1  ;;  %v2172_v37 = vld [vmem:[%s5014_s14 + $0x58] sm:$0xff] }
 0x1c3   :  { %1319 = vmatpush1.msra.mxu0 %v1031_v41  ;;  %1352 = vmatprep.mubr.f32.mxu0 %v5026_v1  ;;  %v2204_v38 = vld [vmem:[%s5014_s14 + $0x158] sm:$0xff]  ;;  %v2171_v41 = vld [vmem:[%s5014_s14 + $0x50] sm:$0xff] }
 0x1c4   :  { %3237 = vmatmul.mubr.msk.f32.vlgmr.msra.gmra.mxu1 %vm648_vm7, %v3878_v54  ;;  %3239 = vmatmul.mubr.msk.f32.vlgmr.msra.gmra.mxu0 %vm648_vm7, %v3878_v54 }
 0x1c5   :  { %1281 = vmatprep.mubr.f32.mxu1 %v5026_v1  ;;  %1358 = vmatprep.mubr.f32.mxu0 %v5026_v1 }
 0x1c6   :  { %3241 = vmatprep.subr.msk.mxu1 %vm323_vm5, %v1369_v42  ;;  %3245 = vmatprep.subr.msk.mxu0 %vm323_vm5, %v1370_v43  ;;  %v2203_v42 = vld [vmem:[%s5014_s14 + $0x150] sm:$0xff]  ;;  %v2186_v43 = vld [vmem:[%s5014_s14 + $0xc8] sm:$0xff] }
 0x1c7   :  { %3242 = vmatpush1.msk.msra.mxu1 %vm323_vm5, %v1021_v39  ;;  %3246 = vmatpush1.msk.msra.mxu0 %vm323_vm5, %v1022_v40  ;;  %v2187_v39 = vld [vmem:[%s5014_s14 + $0xd0] sm:$0xff] }
 0x1c8   :  { %3238 = vmatmul.mubr.msk.f32.gmra.mxu1 %vm648_vm7, %v3870_v51  ;;  %3240 = vmatmul.mubr.msk.f32.gmra.mxu0 %vm648_vm7, %v3870_v51  ;;  %v2219_v40 = vld [vmem:[%s5014_s14 + $0x1d0] sm:$0xff] }
 0x1c9   :  { %1453 = vmatprep.mubr.f32.mxu1 %v5026_v1  ;;  %1530 = vmatprep.mubr.f32.mxu0 %v5026_v1 }
 0x1ca   :  { %3249 = vmatprep.subr.msk.mxu1 %vm323_vm5, %v1371_v46  ;;  %3253 = vmatprep.subr.msk.mxu0 %vm323_vm5, %v1372_v47  ;;  %v2202_v46 = vld [vmem:[%s5014_s14 + $0x148] sm:$0xff]  ;;  %v2185_v47 = vld [vmem:[%s5014_s14 + $0xc0] sm:$0xff] }
 0x1cc   :  { %3243 = vmatmul.mubr.msk.f32.vlgmr.msra.gmra.mxu1 %vm316_vm6, %v3762_v21  ;;  %3247 = vmatmul.mubr.msk.f32.vlgmr.msra.gmra.mxu0 %vm316_vm6, %v3762_v21 }
 0x1cd   :  { %1459 = vmatprep.mubr.f32.mxu1 %v5026_v1  ;;  %1536 = vmatprep.mubr.f32.mxu0 %v5026_v1 }
 0x1ce   :  { %3250 = vmatpush1.msk.msra.mxu1 %vm323_vm5, %v1023_v44  ;;  %3254 = vmatpush1.msk.msra.mxu0 %vm323_vm5, %v1024_v45  ;;  %v2218_v44 = vld [vmem:[%s5014_s14 + $0x1c8] sm:$0xff] }
 0x1cf   :  { %1861 = vmatprep.subr.mxu1 %v1830_v48  ;;  %1938 = vmatprep.subr.mxu0 %v1832_v49  ;;  %v2170_v45 = vld [vmem:[%s5014_s14 + $0x48] sm:$0xff]  ;;  %v2217_v48 = vld [vmem:[%s5014_s14 + $0x1c0] sm:$0xff] }
 0x1d0   :  { %3244 = vmatmul.mubr.msk.f32.gmra.mxu1 %vm316_vm6, %v3776_v24  ;;  %3248 = vmatmul.mubr.msk.f32.gmra.mxu0 %vm316_vm6, %v3776_v24  ;;  %v2169_v49 = vld [vmem:[%s5014_s14 + $0x40] sm:$0xff] }
 0x1d1   :  { %1607 = vmatprep.mubr.f32.mxu1 %v5026_v1  ;;  %1684 = vmatprep.mubr.f32.mxu0 %v5026_v1 }
 0x1d4   :  { %3251 = vmatmul.mubr.msk.f32.vlgmr.msra.gmra.mxu1 %vm316_vm6, %v3762_v21  ;;  %3255 = vmatmul.mubr.msk.f32.vlgmr.msra.gmra.mxu0 %vm316_vm6, %v3762_v21  ;;  %v1814_v21 = vld [vmem:[%s5013_s13 + $0x48] sm:$0xff] }
 0x1d5   :  { %1862 = vmatpush1.msra.mxu1 %v1829_v50  ;;  %1939 = vmatpush1.msra.mxu0 %v1831_v52  ;;  %v2201_v50 = vld [vmem:[%s5014_s14 + $0x140] sm:$0xff]  ;;  %v2184_v52 = vld [vmem:[%s5014_s14 + $0xb8] sm:$0xff] }
 0x1d6   :  { %1863 = vmatprep.subr.mxu1 %v1822_v53  ;;  %1940 = vmatprep.subr.mxu0 %v1824_v55  ;;  %v2216_v53 = vld [vmem:[%s5014_s14 + $0x1b8] sm:$0xff] }
 0x1d7   :  { %1613 = vmatprep.mubr.f32.mxu1 %v5026_v1  ;;  %1690 = vmatprep.mubr.f32.mxu0 %v5026_v1  ;;  %v2168_v55 = vld [vmem:[%s5014_s14 + $0x38] sm:$0xff] }
 0x1d8   :  { %1864 = vmatpush1.msra.mxu1 %v1821_v56  ;;  %1941 = vmatpush1.msra.mxu0 %v1823_v57  ;;  %v2200_v56 = vld [vmem:[%s5014_s14 + $0x138] sm:$0xff]  ;;  %v2183_v57 = vld [vmem:[%s5014_s14 + $0xb0] sm:$0xff] }
 0x1d9   :  { %3252 = vmatmul.mubr.msk.f32.gmra.mxu1 %vm316_vm6, %v3776_v24  ;;  %3256 = vmatmul.mubr.msk.f32.gmra.mxu0 %vm316_vm6, %v3776_v24  ;;  %v1807_v24 = vld [vmem:[%s5013_s13 + $0x10] sm:$0xff] }
 0x1da   :  { %1865 = vmatprep.subr.mxu1 %v1814_v21  ;;  %1942 = vmatprep.subr.mxu0 %v1816_v58  ;;  %v2215_v21 = vld [vmem:[%s5014_s14 + $0x1b0] sm:$0xff] }
 0x1db   :  { %1866 = vmatpush1.msra.mxu1 %v1813_v59  ;;  %1943 = vmatpush1.msra.mxu0 %v1815_v60  ;;  %v2167_v58 = vld [vmem:[%s5014_s14 + $0x30] sm:$0xff]  ;;  %v2182_v60 = vld [vmem:[%s5014_s14 + $0xa8] sm:$0xff] }
 0x1dc   :  { %1867 = vmatprep.subr.mxu1 %v1806_v61  ;;  %1944 = vmatprep.subr.mxu0 %v1808_v62  ;;  %v2199_v59 = vld [vmem:[%s5014_s14 + $0x130] sm:$0xff]  ;;  %v2214_v61 = vld [vmem:[%s5014_s14 + $0x1a8] sm:$0xff] }
 0x1dd   :  { %1868 = vmatpush1.msra.mxu1 %v1805_v63  ;;  %1901 = vmatprep.mubr.f32.mxu1 %v5026_v1  ;;  %v2166_v62 = vld [vmem:[%s5014_s14 + $0x28] sm:$0xff] }
 0x1de   :  { %1945 = vmatpush1.msra.mxu0 %v1807_v24  ;;  %1978 = vmatprep.mubr.f32.mxu0 %v5026_v1  ;;  %v2198_v63 = vld [vmem:[%s5014_s14 + $0x128] sm:$0xff]  ;;  %v2181_v24 = vld [vmem:[%s5014_s14 + $0xa0] sm:$0xff] }
 0x1df   :  { %3257 = vmatmul.mubr.msk.f32.vlgmr.msra.gmra.mxu1 %vm648_vm7, %v3878_v54  ;;  %3259 = vmatmul.mubr.msk.f32.vlgmr.msra.gmra.mxu0 %vm648_vm7, %v3878_v54 }
 0x1e0   :  { %2015 = vmatprep.subr.mxu1 %v1834_v0  ;;  %2092 = vmatprep.subr.mxu0 %v1836_v2  ;;  %v2213_v0 = vld [vmem:[%s5014_s14 + $0x1a0] sm:$0xff] }
 0x1e1   :  { %2016 = vmatpush1.msra.mxu1 %v1833_v3  ;;  %2093 = vmatpush1.msra.mxu0 %v1835_v4  ;;  %v2165_v2 = vld [vmem:[%s5014_s14 + $0x20] sm:$0xff]  ;;  %v2180_v4 = vld [vmem:[%s5014_s14 + $0x98] sm:$0xff] }
 0x1e2   :  { %2017 = vmatprep.subr.mxu1 %v1826_v5  ;;  %2094 = vmatprep.subr.mxu0 %v1828_v6  ;;  %v2197_v3 = vld [vmem:[%s5014_s14 + $0x120] sm:$0xff]  ;;  %v2212_v5 = vld [vmem:[%s5014_s14 + $0x198] sm:$0xff] }
 0x1e3   :  { %1907 = vmatprep.mubr.f32.mxu1 %v5026_v1  ;;  %1984 = vmatprep.mubr.f32.mxu0 %v5026_v1  ;;  %v2164_v6 = vld [vmem:[%s5014_s14 + $0x18] sm:$0xff] }
 0x1e4   :  { %2018 = vmatpush1.msra.mxu1 %v1825_v8  ;;  %2095 = vmatpush1.msra.mxu0 %v1827_v9  ;;  %v2196_v8 = vld [vmem:[%s5014_s14 + $0x118] sm:$0xff]  ;;  %v2179_v9 = vld [vmem:[%s5014_s14 + $0x90] sm:$0xff] }
 0x1e5   :  { %3258 = vmatmul.mubr.msk.f32.gmra.mxu1 %vm648_vm7, %v3870_v51  ;;  %3260 = vmatmul.mubr.msk.f32.gmra.mxu0 %vm648_vm7, %v3870_v51 }
 0x1e6   :  { %2019 = vmatprep.subr.mxu1 %v1818_v10  ;;  %2096 = vmatprep.subr.mxu0 %v1820_v11  ;;  %v2211_v10 = vld [vmem:[%s5014_s14 + $0x190] sm:$0xff] }
 0x1e7   :  { %2020 = vmatpush1.msra.mxu1 %v1817_v12  ;;  %2097 = vmatpush1.msra.mxu0 %v1819_v13  ;;  %v2163_v11 = vld [vmem:[%s5014_s14 + $0x10] sm:$0xff]  ;;  %v2178_v13 = vld [vmem:[%s5014_s14 + $0x88] sm:$0xff] }
 0x1e8   :  { %2021 = vmatprep.subr.mxu1 %v1810_v14  ;;  %2098 = vmatprep.subr.mxu0 %v1812_v15  ;;  %v2195_v12 = vld [vmem:[%s5014_s14 + $0x110] sm:$0xff]  ;;  %v2210_v14 = vld [vmem:[%s5014_s14 + $0x188] sm:$0xff] }
 0x1e9   :  { %2022 = vmatpush1.msra.mxu1 %v1809_v16  ;;  %2055 = vmatprep.mubr.f32.mxu1 %v5026_v1  ;;  %v2162_v15 = vld [vmem:[%s5014_s14 + $0x8] sm:$0xff] }
 0x1ea   :  { %2099 = vmatpush1.msra.mxu0 %v1811_v17  ;;  %2132 = vmatprep.mubr.f32.mxu0 %v5026_v1  ;;  %v2194_v16 = vld [vmem:[%s5014_s14 + $0x108] sm:$0xff]  ;;  %v2177_v17 = vld [vmem:[%s5014_s14 + $0x80] sm:$0xff] }
 0x1eb   :  { %3261 = vmatmul.mubr.msk.f32.vlgmr.msra.gmra.mxu1 %vm648_vm7, %v3878_v54  ;;  %3263 = vmatmul.mubr.msk.f32.vlgmr.msra.gmra.mxu0 %vm648_vm7, %v3878_v54  ;;  %v2176_v54 = vld [vmem:[%s5014_s14 + $0x78] sm:$0xff] }
 0x1ec   :  { %2061 = vmatprep.mubr.f32.mxu1 %v5026_v1  ;;  %2138 = vmatprep.mubr.f32.mxu0 %v5026_v1 }
 0x1ed   :  { %3287 = vmatprep.subr.mxu1 %v2192_v18  ;;  %3325 = vmatprep.subr.mxu0 %v2224_v19  ;;  %v2209_v18 = vld [vmem:[%s5014_s14 + $0x180] sm:$0xff] }
 0x1ee   :  { %3288 = vmatpush3.msra.mxu1 %v2176_v54  ;;  %3326 = vmatpush3.msra.mxu0 %v2208_v20  ;;  %v2161_v19 = vld [vmem:[%s5014_s14] sm:$0xff]  ;;  %v2256_v20 = vld [vmem:[%s5014_s14 + $0x2f8] sm:$0xff] }
 0x1ef   :  { %3262 = vmatmul.mubr.msk.f32.gmra.mxu1 %vm648_vm7, %v3870_v51  ;;  %3264 = vmatmul.mubr.msk.f32.gmra.mxu0 %vm648_vm7, %v3870_v51  ;;  %v2191_v51 = vld [vmem:[%s5014_s14 + $0xf0] sm:$0xff]  ;;  %v2193_v54 = vld [vmem:[%s5014_s14 + $0x100] sm:$0xff] }
 0x1f0   :  { %3289 = vmatprep.subr.mxu1 %v2191_v51  ;;  %3327 = vmatprep.subr.mxu0 %v2223_v22  ;;  %v2288_v51 = vld [vmem:[%s5014_s14 + $0x3f8] sm:$0xff]  ;;  %v4420_v22 = vpop.f32.mrf.mxu0 }
 0x1f1   :  { %3290 = vmatpush3.msra.mxu1 %v2175_v23  ;;  %3328 = vmatpush3.msra.mxu0 %v2207_v25  ;;  %v4422_v23 = vpop.f32.mrf.mxu1 }
 0x1f2   :  { %3291 = vmatprep.subr.mxu1 %v2190_v26  ;;  %3329 = vmatprep.subr.mxu0 %v2222_v27  ;;  %v4424_v25 = vpop.f32.mrf.mxu0 }
 0x1f3   :  { %3292 = vmatpush3.msra.mxu1 %v2174_v28  ;;  %3330 = vmatpush3.msra.mxu0 %v2206_v29  ;;  %v4426_v26 = vpop.f32.mrf.mxu1 }
 0x1f4   :  { %3293 = vmatprep.subr.mxu1 %v2189_v30  ;;  %3331 = vmatprep.subr.mxu0 %v2221_v31  ;;  %v4428_v27 = vpop.f32.mrf.mxu0 }
 0x1f5   :  { %3294 = vmatpush3.msra.mxu1 %v2173_v32  ;;  %3332 = vmatpush3.msra.mxu0 %v2205_v33  ;;  %v4430_v28 = vpop.f32.mrf.mxu1 }
 0x1f6   :  { %3295 = vmatprep.subr.mxu1 %v2188_v34  ;;  %3333 = vmatprep.subr.mxu0 %v2220_v36  ;;  %v4432_v29 = vpop.f32.mrf.mxu0 }
 0x1f7   :  { %3296 = vmatpush3.msra.mxu1 %v2172_v37  ;;  %3334 = vmatpush3.msra.mxu0 %v2204_v38  ;;  %v4434_v30 = vpop.f32.mrf.mxu1 }
 0x1f8   :  { %3297 = vmatprep.subr.mxu1 %v2187_v39  ;;  %3335 = vmatprep.subr.mxu0 %v2219_v40  ;;  %v4436_v31 = vpop.f32.mrf.mxu0 }
 0x1f9   :  { %3298 = vmatpush3.msra.mxu1 %v2171_v41  ;;  %3336 = vmatpush3.msra.mxu0 %v2203_v42  ;;  %5044 = vst [vmem:[#allocation6_spill] sm:$0xff] %v4436_v31  ;;  %v4438_v32 = vpop.f32.mrf.mxu1 }
 0x1fa   :  { %3299 = vmatprep.subr.mxu1 %v2186_v43  ;;  %3337 = vmatprep.subr.mxu0 %v2218_v44  ;;  %5045 = vst [vmem:[#allocation7_spill] sm:$0xff] %v4438_v32  ;;  %v4440_v33 = vpop.f32.mrf.mxu0 }
 0x1fb   :  { %3300 = vmatpush3.msra.mxu1 %v2170_v45  ;;  %3338 = vmatpush3.msra.mxu0 %v2202_v46  ;;  %v4442_v34 = vpop.f32.mrf.mxu1 }
 0x1fc   :  { %3301 = vmatprep.subr.mxu1 %v2185_v47  ;;  %3339 = vmatprep.subr.mxu0 %v2217_v48  ;;  %v4444_v36 = vpop.f32.mrf.mxu0 }
 0x1fd   :  { %3302 = vmatpush3.msra.mxu1 %v2169_v49  ;;  %3340 = vmatpush3.msra.mxu0 %v2201_v50  ;;  %5046 = vst [vmem:[#allocation8_spill] sm:$0xff] %v4444_v36  ;;  %v4446_v37 = vpop.f32.mrf.mxu1 }
 0x1fe   :  { %3303 = vmatprep.subr.mxu1 %v2184_v52  ;;  %3341 = vmatprep.subr.mxu0 %v2216_v53  ;;  %5047 = vst [vmem:[#allocation9_spill] sm:$0xff] %v4446_v37  ;;  %v645_v38 = vpop.f32.mrf.mxu0 }
 0x1ff   :  { %3304 = vmatpush3.msra.mxu1 %v2168_v55  ;;  %3342 = vmatpush3.msra.mxu0 %v2200_v56  ;;  %v568_v39 = vpop.f32.mrf.mxu1 }
 0x200   :  { %3305 = vmatprep.subr.mxu1 %v2183_v57  ;;  %3343 = vmatprep.subr.mxu0 %v2215_v21 }
 0x201   :  { %3306 = vmatpush3.msra.mxu1 %v2167_v58  ;;  %3344 = vmatpush3.msra.mxu0 %v2199_v59 }
 0x202   :  { %3307 = vmatprep.subr.mxu1 %v2182_v60  ;;  %3345 = vmatprep.subr.mxu0 %v2214_v61 }
 0x203   :  { %3308 = vmatpush3.msra.mxu1 %v2166_v62  ;;  %3346 = vmatpush3.msra.mxu0 %v2198_v63 }
 0x204   :  { %3309 = vmatprep.subr.mxu1 %v2181_v24  ;;  %3347 = vmatprep.subr.mxu0 %v2213_v0 }
 0x205   :  { %3310 = vmatpush3.msra.mxu1 %v2165_v2  ;;  %3348 = vmatpush3.msra.mxu0 %v2197_v3 }
 0x206   :  { %3311 = vmatprep.subr.mxu1 %v2180_v4  ;;  %3349 = vmatprep.subr.mxu0 %v2212_v5 }
 0x207   :  { %3312 = vmatpush3.msra.mxu1 %v2164_v6  ;;  %3350 = vmatpush3.msra.mxu0 %v2196_v8 }
 0x208   :  { %3313 = vmatprep.subr.mxu1 %v2179_v9  ;;  %3351 = vmatprep.subr.mxu0 %v2211_v10  ;;  %v4495_v10 = vshrl.u32 %v157_v7, 7 }
 0x209   :  { %3314 = vmatpush3.msra.mxu1 %v2163_v11  ;;  %3352 = vmatpush3.msra.mxu0 %v2195_v12 }
 0x20a   :  { %3315 = vmatprep.subr.mxu1 %v2178_v13  ;;  %3353 = vmatprep.subr.mxu0 %v2210_v14  ;;  %v971_v7 = vsub.s32 1, %v4495_v10 }
 0x20b   :  { %3316 = vmatpush3.msra.mxu1 %v2162_v15  ;;  %3354 = vmatpush3.msra.mxu0 %v2194_v16  ;;  %v4501_v15 = vpop.xlane.xlu1 %265  ;;  %v967_v16 = vsub.s32 0, %v4495_v10 }
 0x20c   :  { %3317 = vmatprep.subr.mxu1 %v2177_v17  ;;  %3355 = vmatprep.subr.mxu0 %v2209_v18  ;;  %v975_v17 = vsub.s32 2, %v4495_v10  ;;  %v4508_v18 = vld [vmem:[%s5009_s9] sm:$0xff] }
 0x20d   :  { %3318 = vmatpush3.msra.mxu1 %v2161_v19  ;;  %3356 = vmatpush3.msra.mxu0 %v2193_v54  ;;  %v979_v19 = vsub.s32 3, %v4495_v10  ;;  %v972_v1 = vrot.slane %v4508_v18, %v971_v7 }
 0x20e   :  { %3363 = vmatprep.subr.mxu1 %v2256_v20  ;;  %3401 = vmatprep.subr.mxu0 %v2288_v51  ;;  %v4515_v51 = vld [vmem:[%s5012_s12] sm:$0xff] }
 0x20f   :  { %v980_v35 = vrot.slane %v4508_v18, %v979_v19  ;;  %v1702_v37 = vrot.slane %v4515_v51, %v967_v16 }
 0x261   :  { %v721_v40 = vpop.f32.mrf.mxu1  ;;  %v798_v41 = vpop.f32.mrf.mxu0 }
 0x263   :  { %v723_v42 = vpop.f32.mrf.mxu1  ;;  %v4448_v43 = vpop.f32.mrf.mxu0 }
 0x264   :  { %v724_v31 = vadd.f32 %v723_v42, %v4426_v26 }
 0x266   :  { %v4450_v44 = vpop.f32.mrf.mxu1  ;;  %v4452_v45 = vpop.f32.mrf.mxu0 }
 0x268   :  { %v4454_v46 = vpop.f32.mrf.mxu1  ;;  %v4456_v47 = vpop.f32.mrf.mxu0 }
 0x26c   :  { %v4458_v48 = vpop.f32.mrf.mxu1  ;;  %v4460_v49 = vpop.f32.mrf.mxu0 }
 0x26d   :  { %5048 = vst [vmem:[#allocation10_spill] sm:$0xff] %v4458_v48  ;;  %5049 = vst [vmem:[#allocation11_spill] sm:$0xff] %v4460_v49  ;;  %v799_v49 = vadd.f32 %v798_v41, %v4420_v22 }
 0x26e   :  { %v4462_v50 = vpop.f32.mrf.mxu1  ;;  %v4464_v52 = vpop.f32.mrf.mxu0 }
 0x272   :  { %v4466_v53 = vpop.f32.mrf.mxu1  ;;  %v4468_v55 = vpop.f32.mrf.mxu0 }
 0x273   :  { %5050 = vst [vmem:[#allocation12_spill] sm:$0xff] %v4466_v53  ;;  %5051 = vst [vmem:[#allocation13_spill] sm:$0xff] %v4468_v55  ;;  %v722_v53 = vadd.f32 %v721_v40, %v4422_v23 }
 0x274   :  { %v883_v56 = vpop.f32.mrf.mxu1  ;;  %v960_v57 = vpop.f32.mrf.mxu0 }
 0x275   :  { %v4470_v21 = vadd.f32 %v883_v56, %v568_v39  ;;  %v4472_v58 = vadd.f32 %v960_v57, %v645_v38  ;;  %v968_v56 = vrot.slane %v4508_v18, %v967_v16  ;;  %v976_v57 = vrot.slane %v4508_v18, %v975_v17 }
 0x276   :  { %v1710_v16 = vrot.slane %v4515_v51, %v975_v17 }
 0x277   :  { %5052 = vst [vmem:[#allocation14_spill] sm:$0xff] %v4470_v21  ;;  %5053 = vst [vmem:[#allocation15_spill] sm:$0xff] %v4472_v58  ;;  %v987_v58 = vsub.s32 5, %v4495_v10  ;;  %v995_v21 = vsub.s32 7, %v4495_v10 }
 0x278   :  { %v1123_v59 = vpop.f32.mrf.mxu1  ;;  %v1200_v60 = vpop.f32.mrf.mxu0 }
 0x279   :  { %v4545_v26 = vrot.slane %v4508_v18, %v987_v58 }
 0x27a   :  { %v1125_v61 = vpop.f32.mrf.mxu1  ;;  %v1202_v62 = vpop.f32.mrf.mxu0 }
 0x27e   :  { %v4474_v63 = vpop.f32.mrf.mxu1  ;;  %v4476_v24 = vpop.f32.mrf.mxu0 }
 0x280   :  { %v4478_v0 = vpop.f32.mrf.mxu1  ;;  %v4480_v2 = vpop.f32.mrf.mxu0 }
 0x284   :  { %v4482_v3 = vpop.f32.mrf.mxu1  ;;  %v4484_v4 = vpop.f32.mrf.mxu0 }
 0x285   :  { %5054 = vst [vmem:[#allocation16_spill] sm:$0xff] %v4482_v3  ;;  %5055 = vst [vmem:[#allocation17_spill] sm:$0xff] %v4484_v4  ;;  %v801_v3 = vadd.f32 %v4448_v43, %v4424_v25  ;;  %v4551_v25 = vrot.slane %v4515_v51, %v987_v58  ;;  %v4554_v43 = vrot.slane %v4515_v51, %v995_v21 }
 0x286   :  { %v4486_v5 = vpop.f32.mrf.mxu1  ;;  %v4488_v6 = vpop.f32.mrf.mxu0  ;;  %v728_v58 = vadd.f32 %v4450_v44, %v4430_v28 }
 0x287   :  { %v1008_v17 = vadd.f32 %v980_v35, %v801_v3 }
 0x288   :  { %v4490_v8 = vpop.f32.mrf.mxu1  ;;  %v4492_v9 = vpop.f32.mrf.mxu0 }
 0x289   :  { %5056 = vst [vmem:[#allocation18_spill] sm:$0xff] %v4490_v8  ;;  %5057 = vst [vmem:[#allocation19_spill] sm:$0xff] %v4492_v9  ;;  %v4523_v9 = vpop.xlane.xlu1 %268  ;;  %v1706_v8 = vrot.slane %v4515_v51, %v971_v7  ;;  %v4539_v7 = vsub.f32 1.0, %v4501_v15 }
 0x28a   :  { %v4497_v11 = vpop.f32.mrf.mxu1  ;;  %v4499_v12 = vpop.f32.mrf.mxu0  ;;  %v4542_v22 = vsub.f32 1.0, %v4523_v9 }
 0x28b   :  { %5058 = vst [vmem:[#allocation20_spill] sm:$0xff] %v4497_v11  ;;  %5059 = vst [vmem:[#allocation21_spill] sm:$0xff] %v4499_v12  ;;  %v1714_v12 = vrot.slane %v4515_v51, %v979_v19 }
 0x28c   :  { %v1455_v13 = vpop.f32.mrf.mxu1  ;;  %v1532_v14 = vpop.f32.mrf.mxu0 }
 0x28d   :  { %v1456_v23 = vadd.f32 %v1455_v13, %v1123_v59  ;;  %v1533_v40 = vadd.f32 %v1532_v14, %v1200_v60  ;;  %v1007_v59 = vadd.f32 %v976_v57, %v799_v49  ;;  %v1006_v60 = vadd.f32 %v972_v1, %v724_v31 }
 0x28e   :  { %v1457_v54 = vpop.f32.mrf.mxu1  ;;  %v1534_v20 = vpop.f32.mrf.mxu0 }
 0x28f   :  { %v1458_v48 = vadd.f32 %v1457_v54, %v1125_v61  ;;  %v1535_v32 = vadd.f32 %v1534_v20, %v1202_v62  ;;  %v1005_v61 = vadd.f32 %v968_v56, %v722_v53  ;;  %v4548_v62 = vrot.slane %v4508_v18, %v995_v21 }
 0x290   :  { %v1461_v38 = vpop.f32.mrf.mxu1  ;;  %v1538_v39 = vpop.f32.mrf.mxu0  ;;  %v1739_v19 = vadd.f32 %v1702_v37, %v1456_v23  ;;  %v1741_v54 = vadd.f32 %v1710_v16, %v1533_v40  ;;  %v805_v21 = vadd.f32 %v4452_v45, %v4428_v27  ;;  %v1757_v27 = vmul.f32 %v1007_v59, %v4501_v15 }
 0x291   :  { %v1740_v13 = vadd.f32 %v1706_v8, %v1458_v48  ;;  %v1742_v14 = vadd.f32 %v1714_v12, %v1535_v32  ;;  %v1462_v20 = vadd.f32 %v1461_v38, %v4474_v63  ;;  %v730_v32 = vadd.f32 %v4454_v46, %v4434_v30 }
 0x292   :  { %v1463_v55 = vpop.f32.mrf.mxu1  ;;  %v1540_v36 = vpop.f32.mrf.mxu0  ;;  %v807_v48 = vadd.f32 %v4456_v47, %v4432_v29  ;;  %v1539_v63 = vadd.f32 %v1538_v39, %v4476_v24  ;;  %v1755_v28 = vmul.f32 %v1005_v61, %v4501_v15  ;;  %v1756_v44 = vmul.f32 %v1006_v60, %v4501_v15 }
 0x293   :  { %v1464_v49 = vadd.f32 %v1463_v55, %v4478_v0  ;;  %v1541_v31 = vadd.f32 %v1540_v36, %v4480_v2  ;;  %v1774_v36 = vmul.f32 %v4539_v7, %v1740_v13  ;;  %v1776_v45 = vmul.f32 %v4539_v7, %v1742_v14 }
 0x294   :  { %v4531_v11 = vpop.f32.mrf.mxu1  ;;  %v4533_v4 = vpop.f32.mrf.mxu0  ;;  %v1747_v30 = vadd.f32 %v1702_v37, %v1462_v20  ;;  %v1773_v46 = vmul.f32 %v4539_v7, %v1739_v19  ;;  %v1775_v29 = vmul.f32 %v4539_v7, %v1741_v54  ;;  %v1758_v47 = vmul.f32 %v1008_v17, %v4501_v15 }
 0x295   :  { %5060 = vst [vmem:[#allocation22_spill] sm:$0xff] %v4533_v4  ;;  %v1013_v55 = vadd.f32 %v968_v56, %v728_v58  ;;  %v1015_v24 = vadd.f32 %v976_v57, %v805_v21  ;;  %v1748_v0 = vadd.f32 %v1706_v8, %v1464_v49  ;;  %v1750_v2 = vadd.f32 %v1714_v12, %v1541_v31  ;;  %v2255_v21 = vld [vmem:[%s5014_s14 + $0x2f0] sm:$0xff] }
 0x296   :  { %v1611_v41 = vpop.f32.mrf.mxu1  ;;  %v1688_v42 = vpop.f32.mrf.mxu0  ;;  %v1014_v39 = vadd.f32 %v972_v1, %v730_v32  ;;  %v1016_v23 = vadd.f32 %v980_v35, %v807_v48  ;;  %v1749_v40 = vadd.f32 %v1710_v16, %v1539_v63  ;;  %v878_v37 = vadd.f32 %v4462_v50, %v4442_v34  ;;  %v2287_v49 = vld [vmem:[%s5014_s14 + $0x3f0] sm:$0xff] }
 0x297   :  { %v1612_v61 = vadd.f32 %v1611_v41, %v4486_v5  ;;  %v1689_v13 = vadd.f32 %v1688_v42, %v4488_v6  ;;  %v1790_v14 = vadd.f32 %v1774_v36, %v1756_v44  ;;  %v1792_v19 = vadd.f32 %v1776_v45, %v1758_v47  ;;  %v2271_v44 = vld [vmem:[%s5014_s14 + $0x370] sm:$0xff] }
 0x298   :  { %v955_v56 = vadd.f32 %v4464_v52, %v4440_v33  ;;  %v1789_v57 = vadd.f32 %v1773_v46, %v1755_v28  ;;  %v1791_v8 = vadd.f32 %v1775_v29, %v1757_v27  ;;  %v1781_v35 = vmul.f32 %v4542_v22, %v1747_v30  ;;  %v2240_v33 = vld [vmem:[%s5014_s14 + $0x278] sm:$0xff]  ;;  %v2239_v27 = vld [vmem:[%s5014_s14 + $0x270] sm:$0xff]  ;;  %v2254_v46 = vld [vmem:[%s5014_s14 + $0x2e8] sm:$0xff] }
 0x299   :  { %v4557_v4 = vpop.f32.mrf.mxu1  ;;  %v4559_v53 = vpop.f32.mrf.mxu0  ;;  %v1782_v41 = vmul.f32 %v4542_v22, %v1748_v0  ;;  %v1784_v17 = vmul.f32 %v4542_v22, %v1750_v2  ;;  %v1744_v34 = vadd.f32 %v4551_v25, %v1612_v61  ;;  %v1783_v42 = vmul.f32 %v4542_v22, %v1749_v40  ;;  %v2272_v52 = vld [vmem:[%s5014_s14 + $0x378] sm:$0xff]  ;;  %v2286_v29 = vld [vmem:[%s5014_s14 + $0x3e8] sm:$0xff] }
 0x29a   :  { %v1746_v54 = vadd.f32 %v4554_v43, %v1689_v13  ;;  %v1764_v20 = vmul.f32 %v1014_v39, %v4523_v9  ;;  %v1766_v58 = vmul.f32 %v1016_v23, %v4523_v9  ;;  %v1010_v31 = vadd.f32 %v4545_v26, %v878_v37  ;;  %v2270_v37 = vld [vmem:[%s5014_s14 + $0x368] sm:$0xff] }
 0x29b   :  { %v4572_v3 = vpop.f32.mrf.mxu1  ;;  %v4574_v38 = vpop.f32.mrf.mxu0  ;;  %v1763_v32 = vmul.f32 %v1013_v55, %v4523_v9  ;;  %v1765_v63 = vmul.f32 %v1015_v24, %v4523_v9  ;;  %v1012_v36 = vadd.f32 %v4548_v62, %v955_v56  ;;  %v1778_v2 = vmul.f32 %v4539_v7, %v1744_v34  ;;  %v2285_v56 = vld [vmem:[%s5014_s14 + $0x3e0] sm:$0xff] }
 0x29c   :  { %v1798_v45 = vadd.f32 %v1782_v41, %v1764_v20  ;;  %v1800_v30 = vadd.f32 %v1784_v17, %v1766_v58  ;;  %v1780_v40 = vmul.f32 %v4539_v7, %v1746_v54  ;;  %v1760_v13 = vmul.f32 %v1010_v31, %v4501_v15  ;;  %v2284_v41 = vld [vmem:[%s5014_s14 + $0x3d8] sm:$0xff]  ;;  %v2283_v54 = vld [vmem:[%s5014_s14 + $0x3d0] sm:$0xff]  ;;  %v2234_v31 = vld [vmem:[%s5014_s14 + $0x248] sm:$0xff] }
 0x29d   :  { %v1797_v47 = vadd.f32 %v1781_v35, %v1763_v32  ;;  %v1799_v55 = vadd.f32 %v1783_v42, %v1765_v63  ;;  %v2236_v42 = vld [vmem:[%s5014_s14 + $0x258] sm:$0xff]  ;;  %v2235_v20 = vld [vmem:[%s5014_s14 + $0x250] sm:$0xff]  ;;  %v2266_v32 = vld [vmem:[%s5014_s14 + $0x348] sm:$0xff] }
 0x29e   :  { %v1794_v35 = vadd.f32 %v1778_v2, %v1760_v13  ;;  %v2267_v58 = vld [vmem:[%s5014_s14 + $0x350] sm:$0xff]  ;;  %v2281_v63 = vld [vmem:[%s5014_s14 + $0x3c0] sm:$0xff] }
 0x29f   :  { %v1903_v59 = vpop.f32.mrf.mxu1  ;;  %v1980_v60 = vpop.f32.mrf.mxu0 }
 0x2a0   :  { %v2145_v50 = vmul.f32 %v1903_v59, %v1789_v57  ;;  %v2147_v6 = vmul.f32 %v1980_v60, %v1791_v8  ;;  %v2238_v60 = vld [vmem:[%s5014_s14 + $0x268] sm:$0xff] }
 0x2a1   :  { %v1905_v12 = vpop.f32.mrf.mxu1  ;;  %v1982_v1 = vpop.f32.mrf.mxu0 }
 0x2a2   :  { %v2146_v16 = vmul.f32 %v1905_v12, %v1790_v14  ;;  %v2148_v5 = vmul.f32 %v1982_v1, %v1792_v19  ;;  %v1762_v14 = vmul.f32 %v1012_v36, %v4501_v15  ;;  %v2253_v19 = vld [vmem:[%s5014_s14 + $0x2e0] sm:$0xff]  ;;  %v991_v36 = vsub.s32 6, %v4495_v10 }
 0x2a3   :  { %v2237_v12 = vld [vmem:[%s5014_s14 + $0x260] sm:$0xff] }
 0x2a4   :  { %2353 = vmatprep.mubr.f32.mxu1 %v2146_v16  ;;  %2428 = vmatprep.mubr.f32.mxu0 %v2148_v5  ;;  %v2269_v1 = vld [vmem:[%s5014_s14 + $0x360] sm:$0xff]  ;;  %v1796_v16 = vadd.f32 %v1780_v40, %v1762_v14  ;;  %v2252_v5 = vld [vmem:[%s5014_s14 + $0x2d8] sm:$0xff]  ;;  %v4734_v13 = vrot.slane %v4508_v18, %v991_v36 }
 0x2a5   :  { %v1909_v48 = vpop.f32.mrf.mxu1  ;;  %v1986_v28 = vpop.f32.mrf.mxu0  ;;  %2354 = vmatmul.mubr.f32.vlgmr.msra.gmra.mxu1 %v2145_v50  ;;  %2429 = vmatmul.mubr.f32.vlgmr.msra.gmra.mxu0 %v2147_v6 }
 0x2a6   :  { %3364 = vmatpush3.msra.mxu1 %v2240_v33  ;;  %3402 = vmatpush3.msra.mxu0 %v2272_v52  ;;  %v2153_v61 = vmul.f32 %v1909_v48, %v1797_v47  ;;  %v2155_v59 = vmul.f32 %v1986_v28, %v1799_v55  ;;  %v2268_v33 = vld [vmem:[%s5014_s14 + $0x358] sm:$0xff]  ;;  %v2251_v52 = vld [vmem:[%s5014_s14 + $0x2d0] sm:$0xff]  ;;  %v2249_v48 = vld [vmem:[%s5014_s14 + $0x2c0] sm:$0xff] }
 0x2a7   :  { %v1911_v24 = vpop.f32.mrf.mxu1  ;;  %v1988_v0 = vpop.f32.mrf.mxu0  ;;  %3365 = vmatprep.subr.mxu1 %v2255_v21  ;;  %3403 = vmatprep.subr.mxu0 %v2287_v49  ;;  %v2250_v21 = vld [vmem:[%s5014_s14 + $0x2c8] sm:$0xff]  ;;  %v2233_v28 = vld [vmem:[%s5014_s14 + $0x240] sm:$0xff]  ;;  %v2247_v55 = vld [vmem:[%s5014_s14 + $0x2b0] sm:$0xff] }
 0x2a8   :  { %v2154_v39 = vmul.f32 %v1911_v24, %v1798_v45  ;;  %v2156_v23 = vmul.f32 %v1988_v0, %v1800_v30  ;;  %3366 = vmatpush3.msra.mxu1 %v2239_v27  ;;  %3404 = vmatpush3.msra.mxu0 %v2271_v44  ;;  %v2282_v49 = vld [vmem:[%s5014_s14 + $0x3c8] sm:$0xff]  ;;  %v2265_v27 = vld [vmem:[%s5014_s14 + $0x340] sm:$0xff]  ;;  %v983_v44 = vsub.s32 4, %v4495_v10  ;;  %v2248_v45 = vld [vmem:[%s5014_s14 + $0x2b8] sm:$0xff] }
 0x2a9   :  { %3367 = vmatprep.subr.mxu1 %v2254_v46  ;;  %3405 = vmatprep.subr.mxu0 %v2286_v29  ;;  %v2280_v30 = vld [vmem:[%s5014_s14 + $0x3b8] sm:$0xff]  ;;  %v2279_v24 = vld [vmem:[%s5014_s14 + $0x3b0] sm:$0xff]  ;;  %v5061_v0 = vld [vmem:[#allocation16_spill] sm:$0xff] }
 0x2aa   :  { %2358 = vmatprep.mubr.f32.mxu1 %v2154_v39  ;;  %2433 = vmatprep.mubr.f32.mxu0 %v2156_v23  ;;  %v2232_v46 = vld [vmem:[%s5014_s14 + $0x238] sm:$0xff]  ;;  %v1718_v47 = vrot.slane %v4515_v51, %v983_v44  ;;  %v1610_v2 = vadd.f32 %v4531_v11, %v5061_v0  ;;  %v5062_v39 = vld [vmem:[#allocation17_spill] sm:$0xff]  ;;  %v5063_v23 = vld [vmem:[#allocation22_spill] sm:$0xff] }
 0x2ab   :  { %v4642_v57 = vpop.f32.mrf.mxu1  ;;  %v4644_v8 = vpop.f32.mrf.mxu0  ;;  %2359 = vmatmul.mubr.f32.gmra.mxu1 %v2153_v61  ;;  %2434 = vmatmul.mubr.f32.gmra.mxu0 %v2155_v59  ;;  %v2264_v29 = vld [vmem:[%s5014_s14 + $0x338] sm:$0xff]  ;;  %v1687_v40 = vadd.f32 %v5063_v23, %v5062_v39  ;;  %v1726_v61 = vrot.slane %v4515_v51, %v991_v36  ;;  %v2231_v59 = vld [vmem:[%s5014_s14 + $0x230] sm:$0xff]  ;;  %v5064_v11 = vld [vmem:[#allocation20_spill] sm:$0xff] }
 0x2ac   :  { %3368 = vmatpush3.msra.mxu1 %v2238_v60  ;;  %3406 = vmatpush3.msra.mxu0 %v2270_v37  ;;  %v2263_v60 = vld [vmem:[%s5014_s14 + $0x330] sm:$0xff]  ;;  %v984_v37 = vrot.slane %v4508_v18, %v983_v44  ;;  %v1618_v14 = vadd.f32 %v4572_v3, %v5064_v11  ;;  %v2246_v51 = vld [vmem:[%s5014_s14 + $0x2a8] sm:$0xff]  ;;  %v5074_v44 = vld [vmem:[#allocation8_spill] sm:$0xff] }
 0x2ad   :  { %v2059_v17 = vpop.f32.mrf.mxu1  ;;  %v2136_v34 = vpop.f32.mrf.mxu0  ;;  %3369 = vmatprep.subr.mxu1 %v2253_v19  ;;  %3407 = vmatprep.subr.mxu0 %v2285_v56  ;;  %v2278_v19 = vld [vmem:[%s5014_s14 + $0x3a8] sm:$0xff]  ;;  %v5065_v56 = vld [vmem:[#allocation7_spill] sm:$0xff] }
 0x2ae   :  { %v2150_v50 = vmul.f32 %v2059_v17, %v1794_v35  ;;  %v2152_v6 = vmul.f32 %v2136_v34, %v1796_v16  ;;  %3370 = vmatpush3.msra.mxu1 %v2237_v12  ;;  %3408 = vmatpush3.msra.mxu0 %v2269_v1  ;;  %v5066_v12 = vld [vmem:[#allocation10_spill] sm:$0xff]  ;;  %v5068_v16 = vld [vmem:[#allocation11_spill] sm:$0xff]  ;;  %v2230_v3 = vld [vmem:[%s5014_s14 + $0x228] sm:$0xff] }
 0x2af   :  { %3371 = vmatprep.subr.mxu1 %v2252_v5  ;;  %3409 = vmatprep.subr.mxu0 %v2284_v41  ;;  %v876_v1 = vadd.f32 %v5066_v12, %v5065_v56  ;;  %v5067_v35 = vld [vmem:[#allocation6_spill] sm:$0xff]  ;;  %v5069_v5 = vld [vmem:[#allocation21_spill] sm:$0xff]  ;;  %v2245_v34 = vld [vmem:[%s5014_s14 + $0x2a0] sm:$0xff]  ;;  %v2063_v23 = vpop.f32.mrf.mxu1 }
 0x2b0   :  { %2503 = vmatprep.mubr.f32.mxu1 %v2150_v50  ;;  %2578 = vmatprep.mubr.f32.mxu0 %v2152_v6  ;;  %v953_v18 = vadd.f32 %v5068_v16, %v5067_v35  ;;  %v1695_v41 = vadd.f32 %v4574_v38, %v5069_v5  ;;  %v2262_v17 = vld [vmem:[%s5014_s14 + $0x328] sm:$0xff]  ;;  %v2277_v38 = vld [vmem:[%s5014_s14 + $0x3a0] sm:$0xff]  ;;  %v1743_v50 = vadd.f32 %v1718_v47, %v1610_v2 }
 0x2b1   :  { %3372 = vmatpush3.msra.mxu1 %v2236_v42  ;;  %3410 = vmatpush3.msra.mxu0 %v2268_v33  ;;  %v1745_v6 = vadd.f32 %v1726_v61, %v1687_v40  ;;  %v5070_v42 = vld [vmem:[#allocation18_spill] sm:$0xff]  ;;  %v5075_v36 = vld [vmem:[#allocation13_spill] sm:$0xff]  ;;  %v2273_v35 = vld [vmem:[%s5014_s14 + $0x380] sm:$0xff] }
 0x2b2   :  { %3373 = vmatprep.subr.mxu1 %v2251_v52  ;;  %3411 = vmatprep.subr.mxu0 %v2283_v54  ;;  %v1616_v33 = vadd.f32 %v4557_v4, %v5070_v42  ;;  %v2229_v52 = vld [vmem:[%s5014_s14 + $0x220] sm:$0xff]  ;;  %v2244_v4 = vld [vmem:[%s5014_s14 + $0x298] sm:$0xff]  ;;  %v1777_v2 = vmul.f32 %v4539_v7, %v1743_v50  ;;  %v2274_v11 = vld [vmem:[%s5014_s14 + $0x388] sm:$0xff] }
 0x2b3   :  { %3374 = vmatpush3.msra.mxu1 %v2235_v20  ;;  %3412 = vmatpush3.msra.mxu0 %v2267_v58  ;;  %v2261_v54 = vld [vmem:[%s5014_s14 + $0x320] sm:$0xff]  ;;  %v5071_v20 = vld [vmem:[#allocation9_spill] sm:$0xff]  ;;  %v1779_v39 = vmul.f32 %v4539_v7, %v1745_v6 }
 0x2b4   :  { %3375 = vmatprep.subr.mxu1 %v2250_v21  ;;  %3413 = vmatprep.subr.mxu0 %v2282_v49  ;;  %v5072_v58 = vld [vmem:[#allocation12_spill] sm:$0xff]  ;;  %v5073_v49 = vld [vmem:[#allocation19_spill] sm:$0xff]  ;;  %v1751_v0 = vadd.f32 %v1718_v47, %v1616_v33  ;;  %v2242_v7 = vld [vmem:[%s5014_s14 + $0x288] sm:$0xff] }
 0x2b5   :  { %3376 = vmatpush3.msra.mxu1 %v2234_v31  ;;  %3414 = vmatpush3.msra.mxu0 %v2266_v32  ;;  %v882_v21 = vadd.f32 %v5072_v58, %v5071_v20  ;;  %v1693_v31 = vadd.f32 %v4559_v53, %v5073_v49  ;;  %v1752_v32 = vadd.f32 %v4551_v25, %v1618_v14  ;;  %v2228_v25 = vld [vmem:[%s5014_s14 + $0x218] sm:$0xff] }
 0x2b6   :  { %3377 = vmatprep.subr.mxu1 %v2249_v48  ;;  %3415 = vmatprep.subr.mxu0 %v2281_v63  ;;  %v2276_v48 = vld [vmem:[%s5014_s14 + $0x398] sm:$0xff]  ;;  %v1009_v63 = vadd.f32 %v984_v37, %v876_v1  ;;  %v1785_v5 = vmul.f32 %v4542_v22, %v1751_v0 }
 0x2b7   :  { %3378 = vmatpush3.msra.mxu1 %v2233_v28  ;;  %3416 = vmatpush3.msra.mxu0 %v2265_v27  ;;  %v1011_v28 = vadd.f32 %v4734_v13, %v953_v18  ;;  %v1754_v27 = vadd.f32 %v4554_v43, %v1695_v41  ;;  %v2260_v53 = vld [vmem:[%s5014_s14 + $0x318] sm:$0xff]  ;;  %v2243_v43 = vld [vmem:[%s5014_s14 + $0x290] sm:$0xff]  ;;  %v1017_v40 = vadd.f32 %v984_v37, %v882_v21  ;;  %v2065_v41 = vpop.f32.mrf.mxu1 }
 0x2b8   :  { %3379 = vmatprep.subr.mxu1 %v2248_v45  ;;  %3417 = vmatprep.subr.mxu0 %v2280_v30  ;;  %v959_v45 = vadd.f32 %v5075_v36, %v5074_v44  ;;  %v5076_v30 = vld [vmem:[#allocation14_spill] sm:$0xff]  ;;  %v1786_v47 = vmul.f32 %v4542_v22, %v1752_v32  ;;  %v1759_v14 = vmul.f32 %v1009_v63, %v4501_v15  ;;  %v2699_v32 = vld [vmem:[%s5017_s17] sm:$0xff] }
 0x2b9   :  { %3380 = vmatpush3.msra.mxu1 %v2232_v46  ;;  %3418 = vmatpush3.msra.mxu0 %v2264_v29  ;;  %v1018_v46 = vadd.f32 %v4545_v26, %v5076_v30  ;;  %v5077_v29 = vld [vmem:[#allocation15_spill] sm:$0xff]  ;;  %v2227_v26 = vld [vmem:[%s5014_s14 + $0x210] sm:$0xff]  ;;  %v1788_v37 = vmul.f32 %v4542_v22, %v1754_v27  ;;  %v2703_v27 = vld [vmem:[%s5017_s17 + $0x20] sm:$0xff] }
 0x2ba   :  { %3381 = vmatprep.subr.mxu1 %v2247_v55  ;;  %3419 = vmatprep.subr.mxu0 %v2279_v24  ;;  %v1020_v55 = vadd.f32 %v4548_v62, %v5077_v29  ;;  %v2275_v24 = vld [vmem:[%s5014_s14 + $0x390] sm:$0xff]  ;;  %v1019_v56 = vadd.f32 %v4734_v13, %v959_v45  ;;  %v1793_v16 = vadd.f32 %v1777_v2, %v1759_v14  ;;  %v2225_v13 = vld [vmem:[%s5014_s14 + $0x200] sm:$0xff] }
 0x2bb   :  { %3382 = vmatpush3.msra.mxu1 %v2231_v59  ;;  %3420 = vmatpush3.msra.mxu0 %v2263_v60  ;;  %v2259_v62 = vld [vmem:[%s5014_s14 + $0x310] sm:$0xff]  ;;  %v1753_v59 = vadd.f32 %v1726_v61, %v1693_v31  ;;  %v2140_v60 = vpop.f32.mrf.mxu0  ;;  %v2226_v61 = vld [vmem:[%s5014_s14 + $0x208] sm:$0xff]  ;;  %v1768_v12 = vmul.f32 %v1018_v46, %v4523_v9 }
 0x2bc   :  { %3383 = vmatprep.subr.mxu1 %v2246_v51  ;;  %3421 = vmatprep.subr.mxu0 %v2278_v19  ;;  %v1761_v51 = vmul.f32 %v1011_v28, %v4501_v15  ;;  %v2258_v19 = vld [vmem:[%s5014_s14 + $0x308] sm:$0xff]  ;;  %v1770_v1 = vmul.f32 %v1020_v55, %v4523_v9  ;;  %v2241_v15 = vld [vmem:[%s5014_s14 + $0x280] sm:$0xff]  ;;  %v2149_v6 = vmul.f32 %v4642_v57, %v1793_v16  ;;  %v5078_v57 = vmov 0.0   ;;  %v2705_v63 = vld [vmem:[%s5017_s17 + $0x30] sm:$0xff] }
 0x2bd   :  { %3384 = vmatpush3.msra.mxu1 %v2230_v3  ;;  %3422 = vmatpush3.msra.mxu0 %v2262_v17  ;;  %v2257_v3 = vld [vmem:[%s5014_s14 + $0x300] sm:$0xff]  ;;  %v1767_v17 = vmul.f32 %v1017_v40, %v4523_v9  ;;  %v2142_v50 = vpop.f32.mrf.mxu0  ;;  %v2700_v31 = vld [vmem:[%s5017_s17 + $0x8] sm:$0xff] }
 0x2be   :  { %3385 = vmatprep.subr.mxu1 %v2245_v34  ;;  %3423 = vmatprep.subr.mxu0 %v2277_v38  ;;  %v1795_v18 = vadd.f32 %v1779_v39, %v1761_v51  ;;  %v1787_v34 = vmul.f32 %v4542_v22, %v1753_v59  ;;  %v1802_v38 = vadd.f32 %v1786_v47, %v1768_v12  ;;  %v2702_v22 = vld [vmem:[%s5017_s17 + $0x18] sm:$0xff]  ;;  %v2704_v28 = vld [vmem:[%s5017_s17 + $0x28] sm:$0xff] }
 0x2bf   :  { %3386 = vmatpush3.msra.mxu1 %v2229_v52  ;;  %3424 = vmatpush3.msra.mxu0 %v2261_v54  ;;  %v1804_v33 = vadd.f32 %v1788_v37, %v1770_v1  ;;  %v1769_v52 = vmul.f32 %v1019_v56, %v4523_v9  ;;  %v1801_v20 = vadd.f32 %v1785_v5, %v1767_v17  ;;  %v2697_v17 = vld [vmem:[%s5016_s16 + $0x50] sm:$0xff] }
 0x2c0   :  { %3387 = vmatprep.subr.mxu1 %v2244_v4  ;;  %3425 = vmatprep.subr.mxu0 %v2276_v48  ;;  %v2151_v42 = vmul.f32 %v4644_v8, %v1795_v18  ;;  %v2158_v54 = vmul.f32 %v2065_v41, %v1802_v38  ;;  %v2701_v8 = vld [vmem:[%s5017_s17 + $0x10] sm:$0xff]  ;;  %v2706_v4 = vld [vmem:[%s5017_s17 + $0x38] sm:$0xff]  ;;  %v5079_v48 = vld [vmem:[#allocation5_spill] sm:$0xff] }
 0x2c1   :  { %3388 = vmatpush3.msra.mxu1 %v2228_v25  ;;  %3426 = vmatpush3.msra.mxu0 %v2260_v53  ;;  %v2160_v58 = vmul.f32 %v2142_v50, %v1804_v33  ;;  %v1803_v21 = vadd.f32 %v1787_v34, %v1769_v52  ;;  %v2157_v9 = vmul.f32 %v2063_v23, %v1801_v20  ;;  %v3265_v25 = vld [vmem:[%s5080_s26] ss:$0 sm:$0xff]  ;;  %v2690_v18 = vld [vmem:[%s5016_s16 + $0x18] sm:$0xff]  ;;  %v2688_v34 = vld [vmem:[%s5016_s16 + $0x8] sm:$0xff] }
 0x2c2   :  { %3389 = vmatprep.subr.mxu1 %v2243_v43  ;;  %3427 = vmatprep.subr.mxu0 %v2275_v24  ;;  %vm2596_vm8 = vcmp.eq.s32.totalorder %v4495_v10, %v3265_v25  ;;  %v2696_v38 = vld [vmem:[%s5016_s16 + $0x48] sm:$0xff]  ;;  %v2687_v50 = vld [vmem:[%s5016_s16] sm:$0xff] }
 0x2c3   :  { %3390 = vmatpush3.msra.mxu1 %v2227_v26  ;;  %3428 = vmatpush3.msra.mxu0 %v2259_v62  ;;  %v2159_v49 = vmul.f32 %v2140_v60, %v1803_v21  ;;  %v3266_v53 = vsel %vm2596_vm8, 1.0, %v5078_v57 }
 0x2c4   :  { %3391 = vmatprep.subr.mxu1 %v2242_v7  ;;  %3429 = vmatprep.subr.mxu0 %v2274_v11  ;;  %v2672_v44 = vsel %vm82_vm1, %v3266_v53, 0.0 }
 0x2c5   :  { %3392 = vmatpush3.msra.mxu1 %v2226_v61  ;;  %3430 = vmatpush3.msra.mxu0 %v2258_v19 }
 0x2c6   :  { %3393 = vmatprep.subr.mxu1 %v2241_v15  ;;  %3431 = vmatprep.subr.mxu0 %v2273_v35 }
 0x2c7   :  { %3394 = vmatpush3.msra.mxu1 %v2225_v13  ;;  %3432 = vmatpush3.msra.mxu0 %v2257_v3  ;;  %v2698_v13 = vld [vmem:[%s5016_s16 + $0x58] sm:$0xff]  ;;  %v2689_v3 = vld [vmem:[%s5016_s16 + $0x10] sm:$0xff] }
 0x2c8   :  { %2504 = vmatmul.mubr.f32.vlgmr.msra.gmra.mxu1 %v2149_v6  ;;  %2579 = vmatmul.mubr.f32.vlgmr.msra.gmra.mxu0 %v2151_v42  ;;  %v2695_v6 = vld [vmem:[%s5016_s16 + $0x40] sm:$0xff] }
 0x2c9   :  { %3491 = vmatprep.subr.mxu0 %v5078_v57  ;;  %2508 = vmatprep.mubr.f32.mxu1 %v2158_v54 }
 0x2ca   :  { %2583 = vmatprep.mubr.f32.mxu0 %v2160_v58  ;;  %3492 = vmatpush3.msra.mxu0 %v2702_v22  ;;  %v3268_v22 = vld [vmem:[%s5015_s15] ss:$0 sm:$0xff] }
 0x2cb   :  { %3493 = vmatprep.subr.mxu0 %v5078_v57  ;;  %3484 = vmatprep.subr.mxu1 %v5078_v57 }
 0x2cc   :  { %3494 = vmatpush3.msra.mxu0 %v2701_v8  ;;  %2509 = vmatmul.mubr.f32.gmra.mxu1 %v2157_v9  ;;  %v2694_v9 = vld [vmem:[%s5016_s16 + $0x38] sm:$0xff] }
 0x2cd   :  { %2584 = vmatmul.mubr.f32.gmra.mxu0 %v2159_v49  ;;  %3495 = vmatprep.subr.mxu0 %v5078_v57  ;;  %v2693_v49 = vld [vmem:[%s5016_s16 + $0x30] sm:$0xff] }
 0x2ce   :  { %3496 = vmatpush3.msra.mxu0 %v2700_v31  ;;  %3499 = vmatprep.mubr.msk.f32.mxu0 %vm3605_vm0, %v5078_v57  ;;  %v2692_v31 = vld [vmem:[%s5016_s16 + $0x28] sm:$0xff] }
 0x2cf   :  { %3497 = vmatprep.subr.mxu0 %v5078_v57  ;;  %3488 = vmatprep.mubr.msk.f32.mxu1 %vm3605_vm0, %v5078_v57 }
 0x2d0   :  { %3498 = vmatpush3.msra.mxu0 %v2699_v32  ;;  %2673 = vadd.xlane.f32.xlu0 %v2672_v44  ;;  %v2691_v32 = vld [vmem:[%s5016_s16 + $0x20] sm:$0xff] }
 0x2d1   :  { %3500 = vmatmul.mubr.msk.f32.vlgmr.msra.gmra.mxu0 %vm648_vm7, %v5079_v48  ;;  %3513 = vmatprep.subr.mxu0 %v5078_v57 }
 0x2d2   :  { %3514 = vmatpush3.msra.mxu0 %v2706_v4  ;;  %3521 = vmatprep.mubr.msk.f32.mxu0 %vm3605_vm0, %v5078_v57  ;;  %v2710_v4 = vld [vmem:[%s5017_s17 + $0x58] sm:$0xff] }
 0x2d3   :  { %3515 = vmatprep.subr.mxu0 %v5078_v57 }
 0x2d4   :  { %3516 = vmatpush3.msra.mxu0 %v2705_v63  ;;  %v2709_v63 = vld [vmem:[%s5017_s17 + $0x50] sm:$0xff] }
 0x2d5   :  { %3517 = vmatprep.subr.mxu0 %v5078_v57 }
 0x2d6   :  { %3518 = vmatpush3.msra.mxu0 %v2704_v28  ;;  %v2708_v28 = vld [vmem:[%s5017_s17 + $0x48] sm:$0xff] }
 0x2d7   :  { %3519 = vmatprep.subr.mxu0 %v5078_v57 }
 0x2d8   :  { %3520 = vmatpush3.msra.mxu0 %v2703_v27  ;;  %v2707_v27 = vld [vmem:[%s5017_s17 + $0x40] sm:$0xff] }
 0x2d9   :  { %3522 = vmatmul.mubr.msk.f32.vlgmr.msra.gmra.mxu0 %vm648_vm7, %v5079_v48  ;;  %3535 = vmatprep.subr.mxu0 %v5078_v57 }
 0x2da   :  { %3543 = vmatprep.mubr.msk.f32.mxu0 %vm3605_vm0, %v5078_v57  ;;  %3536 = vmatpush3.msra.mxu0 %v2698_v13 }
 0x2db   :  { %3537 = vmatprep.subr.mxu0 %v5078_v57 }
 0x2dc   :  { %3538 = vmatpush3.msra.mxu0 %v2697_v17 }
 0x2dd   :  { %3539 = vmatprep.subr.mxu0 %v5078_v57 }
 0x2de   :  { %3540 = vmatpush3.msra.mxu0 %v2696_v38 }
 0x2df   :  { %3541 = vmatprep.subr.mxu0 %v5078_v57 }
 0x2e0   :  { %3542 = vmatpush3.msra.mxu0 %v2695_v6 }
 0x359   :  { %v2674_v42 = vpop.xlane.xlu0 %2673 }
 0x35a   :  { %v2675_v33 = vmax.f32 %v2674_v42, 1.0 }
 0x35c   :  { %3570 = vrcp.f32 %v2675_v33 }
 0x365   :  { %v3319_v36 = vpop.f32.mrf.mxu1  ;;  %v3357_v45 = vpop.f32.mrf.mxu0 }
 0x367   :  { %v3320_v30 = vpop.f32.mrf.mxu1  ;;  %v3358_v46 = vpop.f32.mrf.mxu0 }
 0x368   :  { %v3321_v26 = vadd.f32 %v3320_v30, %v3319_v36  ;;  %v3359_v62 = vadd.f32 %v3358_v46, %v3357_v45 }
 0x369   :  { %v3571_v52 = vpop.eup %3570 }
 0x36a   :  { %v2431_v11 = vadd.f32 %v3359_v62, %v3321_v26 }
 0x36b   :  { %v3322_v29 = vpop.f32.mrf.mxu1  ;;  %v3360_v55 = vpop.f32.mrf.mxu0 }
 0x36d   :  { %v3323_v43 = vpop.f32.mrf.mxu1  ;;  %v3361_v24 = vpop.f32.mrf.mxu0 }
 0x36e   :  { %v3324_v10 = vadd.f32 %v3323_v43, %v3322_v29  ;;  %v3362_v40 = vadd.f32 %v3361_v24, %v3360_v55 }
 0x370   :  { %v2436_v14 = vadd.f32 %v3362_v40, %v3324_v10  ;;  %v3279_v40 = vld [vmem:[%s5021_s21] ss:$0 sm:$0xff] }
 0x388   :  { %v3395_v0 = vpop.f32.mrf.mxu1  ;;  %v3433_v2 = vpop.f32.mrf.mxu0 }
 0x38a   :  { %v3396_v39 = vpop.f32.mrf.mxu1  ;;  %v3434_v23 = vpop.f32.mrf.mxu0 }
 0x38b   :  { %v3397_v60 = vadd.f32 %v3396_v39, %v3395_v0  ;;  %v3435_v1 = vadd.f32 %v3434_v23, %v3433_v2 }
 0x38c   :  { %v3398_v59 = vpop.f32.mrf.mxu1 }
 0x38d   :  { %v3436_v47 = vpop.f32.mrf.mxu0  ;;  %v2506_v61 = vadd.f32 %v3397_v60, %v2431_v11  ;;  %v3277_v60 = vld [vmem:[%s5020_s20] ss:$0 sm:$0xff] }
 0x38e   :  { %v3399_v7 = vpop.f32.mrf.mxu1 }
 0x38f   :  { %v3400_v51 = vadd.f32 %v3399_v7, %v3398_v59  ;;  %v3437_v37 = vpop.f32.mrf.mxu0  ;;  %v2581_v16 = vadd.f32 %v3435_v1, %v2506_v61 }
 0x390   :  { %v3438_v56 = vadd.f32 %v3437_v37, %v3436_v47 }
 0x391   :  { %v2511_v19 = vadd.f32 %v3400_v51, %v2436_v14  ;;  %v4898_v12 = vpop.f32.mrf.mxu0 }
 0x393   :  { %v2586_v15 = vadd.f32 %v3438_v56, %v2511_v19  ;;  %v3501_v35 = vpop.f32.mrf.mxu0 }
 0x395   :  { %3485 = vmatpush3.msra.mxu1 %v2586_v15 }
 0x396   :  { %3486 = vmatprep.subr.mxu1 %v5078_v57 }
 0x397   :  { %3487 = vmatpush3.msra.mxu1 %v2581_v16 }
 0x398   :  { %3489 = vmatmul.mubr.msk.f32.vlgmr.msra.gmra.mxu1 %vm82_vm1, %v3266_v53  ;;  %3502 = vmatprep.subr.mxu1 %v5078_v57  ;;  %v3271_v53 = vld [vmem:[%s5018_s18] ss:$0 sm:$0xff] }
 0x399   :  { %v4906_v5 = vpop.f32.mrf.mxu0  ;;  %3503 = vmatpush3.msra.mxu1 %v2690_v18  ;;  %3510 = vmatprep.mubr.msk.f32.mxu1 %vm3605_vm0, %v5078_v57 }
 0x39a   :  { %3504 = vmatprep.subr.mxu1 %v5078_v57 }
 0x39b   :  { %v3523_v41 = vpop.f32.mrf.mxu0  ;;  %3505 = vmatpush3.msra.mxu1 %v2689_v3 }
 0x39c   :  { %3506 = vmatprep.subr.mxu1 %v5078_v57 }
 0x39d   :  { %3507 = vmatpush3.msra.mxu1 %v2688_v34 }
 0x39e   :  { %3508 = vmatprep.subr.mxu1 %v5078_v57 }
 0x39f   :  { %3509 = vmatpush3.msra.mxu1 %v2687_v50 }
 0x3a0   :  { %3524 = vmatprep.subr.mxu1 %v5078_v57 }
 0x458   :  { %v2668_v54 = vpop.f32.mrf.mxu1 }
 0x459   :  { %v2677_v20 = vmul.f32 %v3571_v52, %v2668_v54 }
 0x45a   :  { %v3490_v58 = vpop.f32.mrf.mxu1 }
 0x45b   :  { %v2685_v21 = vadd.f32 %v3268_v22, %v2677_v20 }
 0x45d   :  { %v2686_v8 = vmax.f32 %v2685_v21, 0.0 }
 0x45f   :  { %3511 = vmatmul.mubr.msk.f32.vlgmr.msra.gmra.mxu1 %vm648_vm7, %v2686_v8  ;;  %3544 = vmatmul.mubr.msk.f32.vlgmr.msra.gmra.mxu0 %vm648_vm7, %v2686_v8 }
 0x460   :  { %3525 = vmatpush3.msra.mxu1 %v2694_v9  ;;  %3532 = vmatprep.mubr.msk.f32.mxu1 %vm3605_vm0, %v5078_v57 }
 0x461   :  { %3526 = vmatprep.subr.mxu1 %v5078_v57 }
 0x462   :  { %3527 = vmatpush3.msra.mxu1 %v2693_v49 }
 0x463   :  { %3528 = vmatprep.subr.mxu1 %v5078_v57 }
 0x464   :  { %3529 = vmatpush3.msra.mxu1 %v2692_v31 }
 0x465   :  { %3530 = vmatprep.subr.mxu1 %v5078_v57 }
 0x466   :  { %3531 = vmatpush3.msra.mxu1 %v2691_v32 }
 0x467   :  { %3533 = vmatmul.mubr.msk.f32.vlgmr.msra.gmra.mxu1 %vm648_vm7, %v2686_v8  ;;  %3546 = vmatprep.subr.mxu1 %v5078_v57 }
 0x468   :  { %3547 = vmatpush3.msra.mxu1 %v2710_v4  ;;  %3554 = vmatprep.mubr.msk.f32.mxu1 %vm3605_vm0, %v5078_v57 }
 0x469   :  { %3548 = vmatprep.subr.mxu1 %v5078_v57 }
 0x46a   :  { %3549 = vmatpush3.msra.mxu1 %v2709_v63 }
 0x46b   :  { %3550 = vmatprep.subr.mxu1 %v5078_v57 }
 0x46c   :  { %3551 = vmatpush3.msra.mxu1 %v2708_v28 }
 0x46d   :  { %3552 = vmatprep.subr.mxu1 %v5078_v57  ;;  %v3275_v57 = vld [vmem:[%s5019_s19] ss:$0 sm:$0xff]  ;;  %s3607_s19 = smov [#allocation2]  }
 0x46e   :  { %3553 = vmatpush3.msra.mxu1 %v2707_v27  ;;  %s3194_s21 = sshll.u32 %s3607_s19, 4  ;;  %s3195_s21 = int_to_ptr.vmem [resolvable:$true] %s3194_s21 }
 0x46f   :  { %3555 = vmatmul.mubr.msk.f32.vlgmr.msra.gmra.mxu1 %vm648_vm7, %v5079_v48  ;;  %s3582_s20 = scalar_lea.vmem %s3195_s21, 128  ;;  %p3587_p1 = scmp.lt.s32.totalorder %s3195_s21, %s3195_s21 }
 0x470   :  { %p3583_p0 = scmp.ne.s32.totalorder %s3195_s21, %s3582_s20  ;;  %p3588_p2 = scmp.lt.s32.totalorder %s3582_s20, %s3582_s20 }
 0x472   :  { %p3589_p3 = por %p3588_p2, %p3587_p1 }
 0x474   :  { %p3590_p4 = pnand %p3589_p3, %p3583_p0 }
 0x51f   :  { %v2853_v25 = vpop.f32.mrf.mxu1  ;;  %v3098_v44 = vpop.f32.mrf.mxu0 }
 0x520   :  { %v2854_v36 = vadd.f32 %v2853_v25, %v4898_v12  ;;  %v3099_v11 = vadd.f32 %v3277_v60, %v3098_v44 }
 0x521   :  { %v3512_v45 = vpop.f32.mrf.mxu1  ;;  %v3545_v30 = vpop.f32.mrf.mxu0 }
 0x522   :  { %v2864_v46 = vadd.f32 %v3271_v53, %v2854_v36 }
 0x524   :  { %v3272_v29 = vmul.f32 -1.442695, %v2864_v46 }
 0x526   :  { %3572 = vpow2.f32 %v3272_v29 }
 0x527   :  { %v3007_v55 = vpop.f32.mrf.mxu1 }
 0x528   :  { %v3008_v43 = vadd.f32 %v3007_v55, %v4906_v5 }
 0x529   :  { %v3534_v24 = vpop.f32.mrf.mxu1 }
 0x52a   :  { %v3018_v0 = vadd.f32 %v3275_v57, %v3008_v43 }
 0x52c   :  { %v3276_v2 = vmul.f32 -1.442695, %v3018_v0 }
 0x52e   :  { %3574 = vpow2.f32 %v3276_v2 }
 0x52f   :  { %v3175_v39 = vpop.f32.mrf.mxu1 }
 0x530   :  { %v3176_v47 = vadd.f32 %v3279_v40, %v3175_v39 }
 0x531   :  { %v3556_v23 = vpop.f32.mrf.mxu1 }
 0x533   :  { %v3573_v26 = vpop.eup %3572 }
 0x534   :  { %v2868_v62 = vadd.f32 1.0, %v3573_v26 }
 0x536   :  { %3576 = vrcp.f32 %v2868_v62 }
 0x53b   :  { %v3575_v10 = vpop.eup %3574 }
 0x53c   :  { %v3022_v59 = vadd.f32 1.0, %v3575_v10 }
 0x53e   :  { %3578 = vrcp.f32 %v3022_v59 }
 0x543   :  { %v3577_v7 = vpop.eup %3576 }
 0x544   :  { %v3179_v14 = vmul.f32 %v3577_v7, %v3176_v47 }
 0x546   :  { %v3180_v51 = vadd.f32 %v3179_v14, %v3099_v11 }
 0x548   :  { %3580 = vtanh.f32 %v3180_v51 }
 0x54b   :  { %v3579_v37 = vpop.eup %3578 }
 0x54c   :  { %v3182_v61 = vsub.f32 1.0, %v3579_v37  ;;  %v3184_v12 = vmul.f32 %v3579_v37, %v5079_v48 }
 0x555   :  { %v3581_v19 = vpop.eup %3580 }
 0x556   :  { %v3183_v56 = vmul.f32 %v3581_v19, %v3182_v61 }
 0x558   :  { %v3185_v1 = vadd.f32 %v3184_v12, %v3183_v56 }
 0x55a   :  { %v3186_v15 = vmax.f32 %v3185_v1, 0.0 }
 0x55c   :  { %3187 = vst.msk [vmem:[#allocation2] sm:$0xff] %vm648_vm7, %v3186_v15 }
 0x55d   :  { %3593 = shalt.err (!%p3590_p4)
}
 0x55e   :  { %3197 = dma.vmem_to_hbm [thread:$0]  %s3195_s21, 128, %s5022_s22, [#allocation3]  }
 0x55f   :  { %3602 = dma.done.wait [#allocation3], 128  }
 0x560   :  { %3603 = vsyncadd [#allocation3], 4294967168 }
 0x561   :  { %3201 = vsyncpa [#allocation3], 1 }

</bundles_post_ra>
